<compile_context>
chip_gen: v7x
topology: tpu7x:2x2x1
jax: 0.10.0
libtpu: 0.0.40
codegen_flags: <defaults>
</compile_context>

<pallas_src>
import functools

import jax
import jax.numpy as jnp
from jax.experimental import pallas as pl
from jax.experimental.pallas import tpu as pltpu

_BN_EPS = 1e-5


# ---------------------------------------------------------------------------
# VMEM budgeting (per generation: v5e/v6e 128 MiB physical, v7x 64 MiB).
# ---------------------------------------------------------------------------
def _round_up(a, b):
    return ((a + b - 1) // b) * b


def _vmem_limits():
    try:
        cap = int(pltpu.get_tpu_info().vmem_capacity_bytes)
    except Exception:
        cap = 64 * 1024 * 1024
    limit = min(cap // 2, 64 * 1024 * 1024)   # scoped VMEM we request
    budget = limit // 2                       # bytes for double-buffered input blocks
    return limit, budget


# ---------------------------------------------------------------------------
# Kernel 1: global average pool over the spatial axis.
#   x2d: (R, S) = (N*C, H*W)  ->  out: (R, 1) = per-row spatial mean.
# ---------------------------------------------------------------------------
def _global_avg_pool_kernel(x_ref, o_ref, acc_ref, *, inv_s, s_total, tile_s,
                            mask_s):
    k = pl.program_id(1)

    @pl.when(k == 0)
    def _init():
        acc_ref[...] = jnp.zeros_like(acc_ref)

    x = x_ref[...].astype(jnp.float32)
    if mask_s:  # static: only emitted when tile_s does not divide S
        col = jax.lax.broadcasted_iota(jnp.int32, x.shape, 1) + k * tile_s
        x = jnp.where(col < s_total, x, 0.0)
    acc_ref[...] += jnp.sum(x, axis=-1, keepdims=True)

    @pl.when(k == pl.num_programs(1) - 1)
    def _finalize():
        o_ref[...] = (acc_ref[...] * inv_s).astype(o_ref.dtype)


def _pool_tiles(R, S, itemsize, budget):
    """Largest row tile whose double-buffered input block fits the VMEM budget;
    tile the reduction (spatial) axis only when S alone is too large."""
    row_align = max(8, 32 // itemsize)            # 8 f32, 16 bf16, 32 int8
    r_cap = min(max(_round_up(R, row_align), row_align), 1024)
    rows_full_s = budget // (2 * S * itemsize)
    if rows_full_s >= row_align:
        tile_r = min((rows_full_s // row_align) * row_align, r_cap)
        return tile_r, S
    # S is huge: tile the reduction axis as well.
    tile_r = min(r_cap, 256)
    tile_s = budget // (2 * tile_r * itemsize)
    tile_s = max(128, (tile_s // 128) * 128)
    tile_s = min(tile_s, _round_up(S, 128))
    return tile_r, tile_s


def global_avg_pool_nchw(x):
    """(N, C, H, W) -> (N, C) spatial mean with f32 accumulation."""
    N, C, H, W = x.shape
    R, S = N * C, H * W
    x2d = x.reshape(R, S)
    limit, budget = _vmem_limits()
    tile_r, tile_s = _pool_tiles(R, S, x2d.dtype.itemsize, budget)
    grid = (pl.cdiv(R, tile_r), pl.cdiv(S, tile_s))

    kernel = functools.partial(
        _global_avg_pool_kernel,
        inv_s=1.0 / float(S),
        s_total=S,
        tile_s=tile_s,
        mask_s=(S % tile_s) != 0,
    )
    out = pl.pallas_call(
        kernel,
        out_shape=jax.ShapeDtypeStruct((R, 1), x.dtype),
        grid_spec=pltpu.PrefetchScalarGridSpec(
            num_scalar_prefetch=0,
            grid=grid,
            in_specs=[pl.BlockSpec((tile_r, tile_s), lambda i, k: (i, k))],
            out_specs=pl.BlockSpec((tile_r, 1), lambda i, k: (i, 0)),
            scratch_shapes=[pltpu.VMEM((tile_r, 1), jnp.float32)],
        ),
        compiler_params=pltpu.CompilerParams(
            dimension_semantics=("parallel", "arbitrary"),
            vmem_limit_bytes=limit,
        ),
    )(x2d)
    return out.reshape(N, C)


# ---------------------------------------------------------------------------
# Kernel 2: fused  Y = relu(X @ W + b)   (BatchNorm already folded into W, b).
# ---------------------------------------------------------------------------
def _matmul_bias_act_kernel(x_ref, w_ref, b_ref, o_ref, acc_ref, *, apply_relu):
    k = pl.program_id(2)

    @pl.when(k == 0)
    def _init():
        acc_ref[...] = jnp.zeros_like(acc_ref)

    acc_ref[...] += jnp.dot(x_ref[...], w_ref[...],
                            preferred_element_type=jnp.float32)

    @pl.when(k == pl.num_programs(2) - 1)
    def _finalize():
        y = acc_ref[...] + b_ref[...]
        if apply_relu:
            y = jnp.maximum(y, 0.0)
        o_ref[...] = y.astype(o_ref.dtype)


def _pick_bk(K):
    if K <= 2048:
        return K, False
    for cand in (2048, 1024, 512, 256, 128):
        if K % cand == 0:
            return cand, False
    return 512, True


def linear_bias_relu(x, w, b, *, apply_relu=True, out_dtype=None):
    """x: (M, K), w: (K, N), b: (N,) -> relu(x @ w + b) of shape (M, N)."""
    M, K = x.shape
    Kw, N = w.shape
    assert K == Kw, (K, Kw)
    out_dtype = out_dtype or x.dtype

    bk, need_pad = _pick_bk(K)
    if need_pad:
        Kp = _round_up(K, bk)
        x = jnp.pad(x, ((0, 0), (0, Kp - K)))
        w = jnp.pad(w, ((0, Kp - K), (0, 0)))
        K = Kp
    bm = M if M < 256 else 256
    bn = N if N < 256 else 256
    b2 = jnp.asarray(b, jnp.float32).reshape(1, N)
    limit, _ = _vmem_limits()

    return pl.pallas_call(
        functools.partial(_matmul_bias_act_kernel, apply_relu=apply_relu),
        out_shape=jax.ShapeDtypeStruct((M, N), out_dtype),
        grid_spec=pltpu.PrefetchScalarGridSpec(
            num_scalar_prefetch=0,
            grid=(pl.cdiv(M, bm), pl.cdiv(N, bn), K // bk),
            in_specs=[
                pl.BlockSpec((bm, bk), lambda i, j, k: (i, k)),
                pl.BlockSpec((bk, bn), lambda i, j, k: (k, j)),
                pl.BlockSpec((1, bn), lambda i, j, k: (0, j)),
            ],
            out_specs=pl.BlockSpec((bm, bn), lambda i, j, k: (i, j)),
            scratch_shapes=[pltpu.VMEM((bm, bn), jnp.float32)],
        ),
        compiler_params=pltpu.CompilerParams(
            dimension_semantics=("parallel", "parallel", "arbitrary"),
            vmem_limit_bytes=limit,
        ),
    )(x, w, b2)


# ---------------------------------------------------------------------------
# BatchNorm folding + conv-as-matmul layout helpers (plain JAX).
# ---------------------------------------------------------------------------
def _fold_bn(p):
    """Fold inference-mode BatchNorm2d into the preceding bias-free conv."""
    scale = p["gamma"] / jnp.sqrt(p["var"] + _BN_EPS)       # (Cout,)
    w = p["w"] * scale[:, None, None, None]                 # (Cout, Cin, kh, kw)
    b = p["beta"] - p["mean"] * scale                       # (Cout,)
    return w, b


def _w1x1_to_mat(w):
    co, ci = w.shape[0], w.shape[1]
    return w.reshape(co, ci).T                              # (Cin, Cout)


def _w3x3_to_mat(w):
    co, ci = w.shape[0], w.shape[1]
    return jnp.transpose(w, (2, 3, 1, 0)).reshape(9 * ci, co)   # (9*Cin, Cout)


def _im2col_dilated3x3(x_nhwc, rate):
    """(N, H, W, C) -> (N*H*W, 9*C) patches of a stride-1 'same' dilated 3x3."""
    N, H, W, C = x_nhwc.shape
    xp = jnp.pad(x_nhwc, ((0, 0), (rate, rate), (rate, rate), (0, 0)))
    taps = []
    for ky in range(3):
        for kx in range(3):
            taps.append(xp[:, ky * rate:ky * rate + H, kx * rate:kx * rate + W, :])
    return jnp.concatenate(taps, axis=-1).reshape(N * H * W, 9 * C)


# ---------------------------------------------------------------------------
# ASPP forward.
# ---------------------------------------------------------------------------
def _aspp_forward(x, params, *, rates):
    """x: (N, Cin, H, W) -> (N, Cout, H, W), inference-mode ASPP."""
    N, Cin, H, W = x.shape
    x_nhwc = jnp.transpose(x, (0, 2, 3, 1))
    x_flat = x_nhwc.reshape(N * H * W, Cin)

    branches = []

    # Branch 0: 1x1 conv + BN + ReLU.
    w_f, b_f = _fold_bn(params["conv1x1"])
    branches.append(linear_bias_relu(x_flat, _w1x1_to_mat(w_f), b_f))

    # Atrous branches: dilated 3x3 conv + BN + ReLU (im2col + matmul kernel).
    for rate, p in zip(rates, params["atrous"]):
        cols = _im2col_dilated3x3(x_nhwc, rate)
        w_f, b_f = _fold_bn(p)
        branches.append(linear_bias_relu(cols, _w3x3_to_mat(w_f), b_f))

    # Pooling branch: global avg pool -> 1x1 conv + BN + ReLU -> broadcast
    # (bilinear upsample of a 1x1 map is constant per (n, c)).
    pooled = global_avg_pool_nchw(x)                        # (N, Cin)
    w_f, b_f = _fold_bn(params["pool"])
    zp = linear_bias_relu(pooled, _w1x1_to_mat(w_f), b_f)   # (N, Cout)
    cout = zp.shape[-1]
    branches.append(
        jnp.broadcast_to(zp[:, None, :], (N, H * W, cout)).reshape(N * H * W, cout))

    # Channel concat (same branch order as torch.cat(dim=1)) + projection CBR.
    cat = jnp.concatenate(branches, axis=-1)                # (N*H*W, n_br*Cout)
    wp, bp = _fold_bn(params["proj"])
    y = linear_bias_relu(cat, _w1x1_to_mat(wp), bp)         # (N*H*W, Cout)
    return jnp.transpose(y.reshape(N, H, W, cout), (0, 3, 1, 2))


class ASPPPallas:
    """Inference-mode ASPP built from the Pallas kernels above."""

    def __init__(self, params, rates):
        self.params = params
        self.rates = tuple(int(r) for r in rates)
        self._fwd = jax.jit(functools.partial(_aspp_forward, rates=self.rates))

    def __call__(self, x):
        return self._fwd(x, self.params)


# ---------------------------------------------------------------------------
# Parameter construction + pure-JAX reference.
# ---------------------------------------------------------------------------
def _init_cbr(key, cin, cout, ksize):
    kw, kg, kb, km, kv = jax.random.split(key, 5)
    return {
        "w": 0.3 * jax.random.normal(kw, (cout, cin, ksize, ksize), jnp.float32),
        "gamma": jax.random.uniform(kg, (cout,), jnp.float32, 0.5, 1.5),
        "beta": 0.1 * jax.random.normal(kb, (cout,), jnp.float32),
        "mean": 0.1 * jax.random.normal(km, (cout,), jnp.float32),
        "var": jax.random.uniform(kv, (cout,), jnp.float32, 0.5, 1.5),
    }


def init_aspp_params(key, cin, rates, cout):
    n_branches = 2 + len(rates)
    keys = jax.random.split(key, 3 + len(rates))
    return {
        "conv1x1": _init_cbr(keys[0], cin, cout, 1),
        "atrous": [_init_cbr(k, cin, cout, 3) for k in keys[1:1 + len(rates)]],
        "pool": _init_cbr(keys[1 + len(rates)], cin, cout, 1),
        "proj": _init_cbr(keys[2 + len(rates)], n_branches * cout, cout, 1),
    }


def _bn_eval_ref(y, p):
    scale = p["gamma"] / jnp.sqrt(p["var"] + _BN_EPS)
    shift = p["beta"] - p["mean"] * scale
    return y * scale[None, :, None, None] + shift[None, :, None, None]


def _cbr_ref(x, p, *, padding=0, dilation=1):
    y = jax.lax.conv_general_dilated(
        x, p["w"], window_strides=(1, 1),
        padding=((padding, padding), (padding, padding)),
        rhs_dilation=(dilation, dilation),
        dimension_numbers=("NCHW", "OIHW", "NCHW"),
        precision=jax.lax.Precision.HIGHEST)
    return jax.nn.relu(_bn_eval_ref(y, p))


def aspp_reference(x, params, rates):
    N, C, H, W = x.shape
    outs = [_cbr_ref(x, params["conv1x1"])]
    for rate, p in zip(rates, params["atrous"]):
        outs.append(_cbr_ref(x, p, padding=rate, dilation=rate))
    pooled = jnp.mean(x, axis=(2, 3), keepdims=True)             # (N, C, 1, 1)
    yp = _cbr_ref(pooled, params["pool"])                        # (N, Cout, 1, 1)
    outs.append(jnp.broadcast_to(yp, (N, yp.shape[1], H, W)))    # 1x1 -> HxW
    cat = jnp.concatenate(outs, axis=1)
    return _cbr_ref(cat, params["proj"])


if __name__ == "__main__":
    key = jax.random.PRNGKey(0)
    k_x, k_p = jax.random.split(key)

    N, Cin, H, W = 2, 4, 16, 16
    Cout = 8
    rates = (2, 4)

    x = jax.random.normal(k_x, (N, Cin, H, W), dtype=jnp.float32)
    params = init_aspp_params(k_p, Cin, rates, Cout)

    model = ASPPPallas(params, rates)
    out = jax.block_until_ready(model(x))
    assert out.shape == (N, Cout, H, W), out.shape

    ref = jax.block_until_ready(aspp_reference(x, params, rates))
    max_err = float(jnp.max(jnp.abs(out - ref)))
    assert jnp.allclose(out, ref, atol=2e-2, rtol=2e-2), max_err

    # Standalone check of the pooling kernel against its reference.
    pooled = jax.block_until_ready(jax.jit(global_avg_pool_nchw)(x))
    assert jnp.allclose(pooled, jnp.mean(x, axis=(2, 3)), atol=1e-5, rtol=1e-5)

    print("KERNEL_OK")
</pallas_src>

<mosaic_0001>
module attributes {stable_mosaic.version = 11 : i64} {
  func.func @_matmul_bias_act_kernel(%arg0: i32, %arg1: i32, %arg2: i32, %arg3: memref<256x36xf32, #tpu.memory_space<vmem>>, %arg4: memref<36x8xf32, #tpu.memory_space<vmem>>, %arg5: memref<1x8xf32, #tpu.memory_space<vmem>>, %arg6: memref<256x8xf32, #tpu.memory_space<vmem>>, %arg7: memref<256x8xf32, #tpu.memory_space<vmem>>) attributes {dimension_semantics = [#tpu.dimension_semantics<parallel>, #tpu.dimension_semantics<parallel>, #tpu.dimension_semantics<arbitrary>], iteration_bounds = array<i64: 2, 1, 1>, scalar_prefetch = 0 : i64, scratch_operands = 1 : i64, tpu.core_type = #tpu.core_type<tc>, window_params = [{transform_indices = @transform_0, window_bounds = array<i64: 256, 36>}, {transform_indices = @transform_1, window_bounds = array<i64: 36, 8>}, {transform_indices = @transform_2, window_bounds = array<i64: 1, 8>}, {transform_indices = @transform_3, window_bounds = array<i64: 256, 8>}]} {
    %c0_i32 = arith.constant 0 : i32
    %0 = arith.cmpi eq, %arg2, %c0_i32 : i32
    %1 = arith.extui %0 : i1 to i32
    %c0_i32_0 = arith.constant 0 : i32
    %2 = arith.cmpi ne, %1, %c0_i32_0 : i32
    scf.if %2 {
      %cst_10 = arith.constant 0.000000e+00 : f32
      %12 = vector.broadcast %cst_10 : f32 to vector<256x8xf32>
      %c0_11 = arith.constant 0 : index
      %c0_12 = arith.constant 0 : index
      %13 = vector.load %arg7[%c0_11, %c0_12] : memref<256x8xf32, #tpu.memory_space<vmem>>, vector<256x8xf32>
      tpu.vector_store %arg7[%c0_11, %c0_12], %12 {strides = array<i32>} : memref<256x8xf32, #tpu.memory_space<vmem>>, vector<256x8xf32>,
    } else {
    }
    %c0 = arith.constant 0 : index
    %c0_1 = arith.constant 0 : index
    %3 = vector.load %arg7[%c0, %c0_1] : memref<256x8xf32, #tpu.memory_space<vmem>>, vector<256x8xf32>
    %c0_2 = arith.constant 0 : index
    %c0_3 = arith.constant 0 : index
    %4 = vector.load %arg3[%c0_2, %c0_3] : memref<256x36xf32, #tpu.memory_space<vmem>>, vector<256x36xf32>
    %c0_4 = arith.constant 0 : index
    %c0_5 = arith.constant 0 : index
    %5 = vector.load %arg4[%c0_4, %c0_5] : memref<36x8xf32, #tpu.memory_space<vmem>>, vector<36x8xf32>
    %cst = arith.constant dense<0.000000e+00> : vector<256x8xf32>
    %6 = tpu.matmul %4, %5, %cst {dimension_numbers = #tpu.dot_dimension_numbers<[1], [0], [0], [1], [0, 0, 1, 1], [], []>} : vector<256x36xf32>, vector<36x8xf32>, vector<256x8xf32> -> vector<256x8xf32>
    %7 = arith.addf %3, %6 : vector<256x8xf32>
    %c0_6 = arith.constant 0 : index
    %c0_7 = arith.constant 0 : index
    %8 = vector.load %arg7[%c0_6, %c0_7] : memref<256x8xf32, #tpu.memory_space<vmem>>, vector<256x8xf32>
    tpu.vector_store %arg7[%c0_6, %c0_7], %7 {strides = array<i32>} : memref<256x8xf32, #tpu.memory_space<vmem>>, vector<256x8xf32>,
    %c0_i32_8 = arith.constant 0 : i32
    %9 = arith.cmpi eq, %arg2, %c0_i32_8 : i32
    %10 = arith.extui %9 : i1 to i32
    %c0_i32_9 = arith.constant 0 : i32
    %11 = arith.cmpi ne, %10, %c0_i32_9 : i32
    scf.if %11 {
      %c0_10 = arith.constant 0 : index
      %c0_11 = arith.constant 0 : index
      %12 = vector.load %arg7[%c0_10, %c0_11] : memref<256x8xf32, #tpu.memory_space<vmem>>, vector<256x8xf32>
      %c0_12 = arith.constant 0 : index
      %c0_13 = arith.constant 0 : index
      %13 = vector.load %arg5[%c0_12, %c0_13] : memref<1x8xf32, #tpu.memory_space<vmem>>, vector<1x8xf32>
      %14 = vector.broadcast %13 : vector<1x8xf32> to vector<256x8xf32>
      %15 = arith.addf %12, %14 : vector<256x8xf32>
      %cst_14 = arith.constant 0.000000e+00 : f32
      %16 = vector.broadcast %cst_14 : f32 to vector<256x8xf32>
      %17 = arith.maximumf %15, %16 : vector<256x8xf32>
      %c0_15 = arith.constant 0 : index
      %c0_16 = arith.constant 0 : index
      %18 = vector.load %arg6[%c0_15, %c0_16] : memref<256x8xf32, #tpu.memory_space<vmem>>, vector<256x8xf32>
      tpu.vector_store %arg6[%c0_15, %c0_16], %17 {strides = array<i32>} : memref<256x8xf32, #tpu.memory_space<vmem>>, vector<256x8xf32>,
    } else {
    }
    return
  }
  func.func @transform_0(%arg0: i32, %arg1: i32, %arg2: i32) -> (i32, i32) {
    %c0_i32 = arith.constant 0 : i32
    return %arg0, %arg2 : i32, i32
  }
  func.func @transform_1(%arg0: i32, %arg1: i32, %arg2: i32) -> (i32, i32) {
    %c0_i32 = arith.constant 0 : i32
    return %arg2, %arg1 : i32, i32
  }
  func.func @transform_2(%arg0: i32, %arg1: i32, %arg2: i32) -> (i32, i32) {
    %c0_i32 = arith.constant 0 : i32
    %c0_i32_0 = arith.constant 0 : i32
    return %c0_i32, %arg1 : i32, i32
  }
  func.func @transform_3(%arg0: i32, %arg1: i32, %arg2: i32) -> (i32, i32) {
    %c0_i32 = arith.constant 0 : i32
    return %arg0, %arg1 : i32, i32
  }
}

module attributes {stable_mosaic.version = 11 : i64} {
  func.func @_matmul_bias_act_kernel(%arg0: i32, %arg1: i32, %arg2: i32, %arg3: memref<256x4xf32, #tpu.memory_space<vmem>>, %arg4: memref<4x8xf32, #tpu.memory_space<vmem>>, %arg5: memref<1x8xf32, #tpu.memory_space<vmem>>, %arg6: memref<256x8xf32, #tpu.memory_space<vmem>>, %arg7: memref<256x8xf32, #tpu.memory_space<vmem>>) attributes {dimension_semantics = [#tpu.dimension_semantics<parallel>, #tpu.dimension_semantics<parallel>, #tpu.dimension_semantics<arbitrary>], iteration_bounds = array<i64: 2, 1, 1>, scalar_prefetch = 0 : i64, scratch_operands = 1 : i64, tpu.core_type = #tpu.core_type<tc>, window_params = [{transform_indices = @transform_0, window_bounds = array<i64: 256, 4>}, {transform_indices = @transform_1, window_bounds = array<i64: 4, 8>}, {transform_indices = @transform_2, window_bounds = array<i64: 1, 8>}, {transform_indices = @transform_3, window_bounds = array<i64: 256, 8>}]} {
    %c0_i32 = arith.constant 0 : i32
    %0 = arith.cmpi eq, %arg2, %c0_i32 : i32
    %1 = arith.extui %0 : i1 to i32
    %c0_i32_0 = arith.constant 0 : i32
    %2 = arith.cmpi ne, %1, %c0_i32_0 : i32
    scf.if %2 {
      %cst_10 = arith.constant 0.000000e+00 : f32
      %12 = vector.broadcast %cst_10 : f32 to vector<256x8xf32>
      %c0_11 = arith.constant 0 : index
      %c0_12 = arith.constant 0 : index
      %13 = vector.load %arg7[%c0_11, %c0_12] : memref<256x8xf32, #tpu.memory_space<vmem>>, vector<256x8xf32>
      tpu.vector_store %arg7[%c0_11, %c0_12], %12 {strides = array<i32>} : memref<256x8xf32, #tpu.memory_space<vmem>>, vector<256x8xf32>,
    } else {
    }
    %c0 = arith.constant 0 : index
    %c0_1 = arith.constant 0 : index
    %3 = vector.load %arg7[%c0, %c0_1] : memref<256x8xf32, #tpu.memory_space<vmem>>, vector<256x8xf32>
    %c0_2 = arith.constant 0 : index
    %c0_3 = arith.constant 0 : index
    %4 = vector.load %arg3[%c0_2, %c0_3] : memref<256x4xf32, #tpu.memory_space<vmem>>, vector<256x4xf32>
    %c0_4 = arith.constant 0 : index
    %c0_5 = arith.constant 0 : index
    %5 = vector.load %arg4[%c0_4, %c0_5] : memref<4x8xf32, #tpu.memory_space<vmem>>, vector<4x8xf32>
    %cst = arith.constant dense<0.000000e+00> : vector<256x8xf32>
    %6 = tpu.matmul %4, %5, %cst {dimension_numbers = #tpu.dot_dimension_numbers<[1], [0], [0], [1], [0, 0, 1, 1], [], []>} : vector<256x4xf32>, vector<4x8xf32>, vector<256x8xf32> -> vector<256x8xf32>
    %7 = arith.addf %3, %6 : vector<256x8xf32>
    %c0_6 = arith.constant 0 : index
    %c0_7 = arith.constant 0 : index
    %8 = vector.load %arg7[%c0_6, %c0_7] : memref<256x8xf32, #tpu.memory_space<vmem>>, vector<256x8xf32>
    tpu.vector_store %arg7[%c0_6, %c0_7], %7 {strides = array<i32>} : memref<256x8xf32, #tpu.memory_space<vmem>>, vector<256x8xf32>,
    %c0_i32_8 = arith.constant 0 : i32
    %9 = arith.cmpi eq, %arg2, %c0_i32_8 : i32
    %10 = arith.extui %9 : i1 to i32
    %c0_i32_9 = arith.constant 0 : i32
    %11 = arith.cmpi ne, %10, %c0_i32_9 : i32
    scf.if %11 {
      %c0_10 = arith.constant 0 : index
      %c0_11 = arith.constant 0 : index
      %12 = vector.load %arg7[%c0_10, %c0_11] : memref<256x8xf32, #tpu.memory_space<vmem>>, vector<256x8xf32>
      %c0_12 = arith.constant 0 : index
      %c0_13 = arith.constant 0 : index
      %13 = vector.load %arg5[%c0_12, %c0_13] : memref<1x8xf32, #tpu.memory_space<vmem>>, vector<1x8xf32>
      %14 = vector.broadcast %13 : vector<1x8xf32> to vector<256x8xf32>
      %15 = arith.addf %12, %14 : vector<256x8xf32>
      %cst_14 = arith.constant 0.000000e+00 : f32
      %16 = vector.broadcast %cst_14 : f32 to vector<256x8xf32>
      %17 = arith.maximumf %15, %16 : vector<256x8xf32>
      %c0_15 = arith.constant 0 : index
      %c0_16 = arith.constant 0 : index
      %18 = vector.load %arg6[%c0_15, %c0_16] : memref<256x8xf32, #tpu.memory_space<vmem>>, vector<256x8xf32>
      tpu.vector_store %arg6[%c0_15, %c0_16], %17 {strides = array<i32>} : memref<256x8xf32, #tpu.memory_space<vmem>>, vector<256x8xf32>,
    } else {
    }
    return
  }
  func.func @transform_0(%arg0: i32, %arg1: i32, %arg2: i32) -> (i32, i32) {
    %c0_i32 = arith.constant 0 : i32
    return %arg0, %arg2 : i32, i32
  }
  func.func @transform_1(%arg0: i32, %arg1: i32, %arg2: i32) -> (i32, i32) {
    %c0_i32 = arith.constant 0 : i32
    return %arg2, %arg1 : i32, i32
  }
  func.func @transform_2(%arg0: i32, %arg1: i32, %arg2: i32) -> (i32, i32) {
    %c0_i32 = arith.constant 0 : i32
    %c0_i32_0 = arith.constant 0 : i32
    return %c0_i32, %arg1 : i32, i32
  }
  func.func @transform_3(%arg0: i32, %arg1: i32, %arg2: i32) -> (i32, i32) {
    %c0_i32 = arith.constant 0 : i32
    return %arg0, %arg1 : i32, i32
  }
}

module attributes {stable_mosaic.version = 11 : i64} {
  func.func @_global_avg_pool_kernel(%arg0: i32, %arg1: i32, %arg2: memref<8x256xf32, #tpu.memory_space<vmem>>, %arg3: memref<8x1xf32, #tpu.memory_space<vmem>>, %arg4: memref<8x1xf32, #tpu.memory_space<vmem>>) attributes {dimension_semantics = [#tpu.dimension_semantics<parallel>, #tpu.dimension_semantics<arbitrary>], iteration_bounds = array<i64: 1, 1>, scalar_prefetch = 0 : i64, scratch_operands = 1 : i64, tpu.core_type = #tpu.core_type<tc>, window_params = [{transform_indices = @transform_0, window_bounds = array<i64: 8, 256>}, {transform_indices = @transform_1, window_bounds = array<i64: 8, 1>}]} {
    %c0_i32 = arith.constant 0 : i32
    %0 = arith.cmpi eq, %arg1, %c0_i32 : i32
    %1 = arith.extui %0 : i1 to i32
    %c0_i32_0 = arith.constant 0 : i32
    %2 = arith.cmpi ne, %1, %c0_i32_0 : i32
    scf.if %2 {
      %cst_8 = arith.constant 0.000000e+00 : f32
      %12 = vector.broadcast %cst_8 : f32 to vector<8x1xf32>
      %c0_9 = arith.constant 0 : index
      %c0_10 = arith.constant 0 : index
      %13 = vector.load %arg4[%c0_9, %c0_10] : memref<8x1xf32, #tpu.memory_space<vmem>>, vector<8x1xf32>
      tpu.vector_store %arg4[%c0_9, %c0_10], %12 {strides = array<i32>} : memref<8x1xf32, #tpu.memory_space<vmem>>, vector<8x1xf32>,
    } else {
    }
    %c0 = arith.constant 0 : index
    %c0_1 = arith.constant 0 : index
    %3 = vector.load %arg2[%c0, %c0_1] : memref<8x256xf32, #tpu.memory_space<vmem>>, vector<8x256xf32>
    %c0_2 = arith.constant 0 : index
    %c0_3 = arith.constant 0 : index
    %4 = vector.load %arg4[%c0_2, %c0_3] : memref<8x1xf32, #tpu.memory_space<vmem>>, vector<8x1xf32>
    %cst = arith.constant dense<0.000000e+00> : vector<8xf32>
    %5 = vector.multi_reduction <add>, %3, %cst [1] : vector<8x256xf32> to vector<8xf32>
    %6 = vector.shape_cast %5 : vector<8xf32> to vector<8x1xf32>
    %7 = arith.addf %4, %6 : vector<8x1xf32>
    %c0_4 = arith.constant 0 : index
    %c0_5 = arith.constant 0 : index
    %8 = vector.load %arg4[%c0_4, %c0_5] : memref<8x1xf32, #tpu.memory_space<vmem>>, vector<8x1xf32>
    tpu.vector_store %arg4[%c0_4, %c0_5], %7 {strides = array<i32>} : memref<8x1xf32, #tpu.memory_space<vmem>>, vector<8x1xf32>,
    %c0_i32_6 = arith.constant 0 : i32
    %9 = arith.cmpi eq, %arg1, %c0_i32_6 : i32
    %10 = arith.extui %9 : i1 to i32
    %c0_i32_7 = arith.constant 0 : i32
    %11 = arith.cmpi ne, %10, %c0_i32_7 : i32
    scf.if %11 {
      %c0_8 = arith.constant 0 : index
      %c0_9 = arith.constant 0 : index
      %12 = vector.load %arg4[%c0_8, %c0_9] : memref<8x1xf32, #tpu.memory_space<vmem>>, vector<8x1xf32>
      %cst_10 = arith.constant 3.906250e-03 : f32
      %13 = vector.broadcast %cst_10 : f32 to vector<8x1xf32>
      %14 = arith.mulf %12, %13 : vector<8x1xf32>
      %c0_11 = arith.constant 0 : index
      %c0_12 = arith.constant 0 : index
      %15 = vector.load %arg3[%c0_11, %c0_12] : memref<8x1xf32, #tpu.memory_space<vmem>>, vector<8x1xf32>
      tpu.vector_store %arg3[%c0_11, %c0_12], %14 {strides = array<i32>} : memref<8x1xf32, #tpu.memory_space<vmem>>, vector<8x1xf32>,
    } else {
    }
    return
  }
  func.func @transform_0(%arg0: i32, %arg1: i32) -> (i32, i32) {
    %c0_i32 = arith.constant 0 : i32
    return %arg0, %arg1 : i32, i32
  }
  func.func @transform_1(%arg0: i32, %arg1: i32) -> (i32, i32) {
    %c0_i32 = arith.constant 0 : i32
    %c0_i32_0 = arith.constant 0 : i32
    return %arg0, %c0_i32 : i32, i32
  }
}

module attributes {stable_mosaic.version = 11 : i64} {
  func.func @_matmul_bias_act_kernel(%arg0: i32, %arg1: i32, %arg2: i32, %arg3: memref<2x4xf32, #tpu.memory_space<vmem>>, %arg4: memref<4x8xf32, #tpu.memory_space<vmem>>, %arg5: memref<1x8xf32, #tpu.memory_space<vmem>>, %arg6: memref<2x8xf32, #tpu.memory_space<vmem>>, %arg7: memref<2x8xf32, #tpu.memory_space<vmem>>) attributes {dimension_semantics = [#tpu.dimension_semantics<parallel>, #tpu.dimension_semantics<parallel>, #tpu.dimension_semantics<arbitrary>], iteration_bounds = array<i64: 1, 1, 1>, scalar_prefetch = 0 : i64, scratch_operands = 1 : i64, tpu.core_type = #tpu.core_type<tc>, window_params = [{transform_indices = @transform_0, window_bounds = array<i64: 2, 4>}, {transform_indices = @transform_1, window_bounds = array<i64: 4, 8>}, {transform_indices = @transform_2, window_bounds = array<i64: 1, 8>}, {transform_indices = @transform_3, window_bounds = array<i64: 2, 8>}]} {
    %c0_i32 = arith.constant 0 : i32
    %0 = arith.cmpi eq, %arg2, %c0_i32 : i32
    %1 = arith.extui %0 : i1 to i32
    %c0_i32_0 = arith.constant 0 : i32
    %2 = arith.cmpi ne, %1, %c0_i32_0 : i32
    scf.if %2 {
      %cst_10 = arith.constant 0.000000e+00 : f32
      %12 = vector.broadcast %cst_10 : f32 to vector<2x8xf32>
      %c0_11 = arith.constant 0 : index
      %c0_12 = arith.constant 0 : index
      %13 = vector.load %arg7[%c0_11, %c0_12] : memref<2x8xf32, #tpu.memory_space<vmem>>, vector<2x8xf32>
      tpu.vector_store %arg7[%c0_11, %c0_12], %12 {strides = array<i32>} : memref<2x8xf32, #tpu.memory_space<vmem>>, vector<2x8xf32>,
    } else {
    }
    %c0 = arith.constant 0 : index
    %c0_1 = arith.constant 0 : index
    %3 = vector.load %arg7[%c0, %c0_1] : memref<2x8xf32, #tpu.memory_space<vmem>>, vector<2x8xf32>
    %c0_2 = arith.constant 0 : index
    %c0_3 = arith.constant 0 : index
    %4 = vector.load %arg3[%c0_2, %c0_3] : memref<2x4xf32, #tpu.memory_space<vmem>>, vector<2x4xf32>
    %c0_4 = arith.constant 0 : index
    %c0_5 = arith.constant 0 : index
    %5 = vector.load %arg4[%c0_4, %c0_5] : memref<4x8xf32, #tpu.memory_space<vmem>>, vector<4x8xf32>
    %cst = arith.constant dense<0.000000e+00> : vector<2x8xf32>
    %6 = tpu.matmul %4, %5, %cst {dimension_numbers = #tpu.dot_dimension_numbers<[1], [0], [0], [1], [0, 0, 1, 1], [], []>} : vector<2x4xf32>, vector<4x8xf32>, vector<2x8xf32> -> vector<2x8xf32>
    %7 = arith.addf %3, %6 : vector<2x8xf32>
    %c0_6 = arith.constant 0 : index
    %c0_7 = arith.constant 0 : index
    %8 = vector.load %arg7[%c0_6, %c0_7] : memref<2x8xf32, #tpu.memory_space<vmem>>, vector<2x8xf32>
    tpu.vector_store %arg7[%c0_6, %c0_7], %7 {strides = array<i32>} : memref<2x8xf32, #tpu.memory_space<vmem>>, vector<2x8xf32>,
    %c0_i32_8 = arith.constant 0 : i32
    %9 = arith.cmpi eq, %arg2, %c0_i32_8 : i32
    %10 = arith.extui %9 : i1 to i32
    %c0_i32_9 = arith.constant 0 : i32
    %11 = arith.cmpi ne, %10, %c0_i32_9 : i32
    scf.if %11 {
      %c0_10 = arith.constant 0 : index
      %c0_11 = arith.constant 0 : index
      %12 = vector.load %arg7[%c0_10, %c0_11] : memref<2x8xf32, #tpu.memory_space<vmem>>, vector<2x8xf32>
      %c0_12 = arith.constant 0 : index
      %c0_13 = arith.constant 0 : index
      %13 = vector.load %arg5[%c0_12, %c0_13] : memref<1x8xf32, #tpu.memory_space<vmem>>, vector<1x8xf32>
      %14 = vector.broadcast %13 : vector<1x8xf32> to vector<2x8xf32>
      %15 = arith.addf %12, %14 : vector<2x8xf32>
      %cst_14 = arith.constant 0.000000e+00 : f32
      %16 = vector.broadcast %cst_14 : f32 to vector<2x8xf32>
      %17 = arith.maximumf %15, %16 : vector<2x8xf32>
      %c0_15 = arith.constant 0 : index
      %c0_16 = arith.constant 0 : index
      %18 = vector.load %arg6[%c0_15, %c0_16] : memref<2x8xf32, #tpu.memory_space<vmem>>, vector<2x8xf32>
      tpu.vector_store %arg6[%c0_15, %c0_16], %17 {strides = array<i32>} : memref<2x8xf32, #tpu.memory_space<vmem>>, vector<2x8xf32>,
    } else {
    }
    return
  }
  func.func @transform_0(%arg0: i32, %arg1: i32, %arg2: i32) -> (i32, i32) {
    %c0_i32 = arith.constant 0 : i32
    return %arg0, %arg2 : i32, i32
  }
  func.func @transform_1(%arg0: i32, %arg1: i32, %arg2: i32) -> (i32, i32) {
    %c0_i32 = arith.constant 0 : i32
    return %arg2, %arg1 : i32, i32
  }
  func.func @transform_2(%arg0: i32, %arg1: i32, %arg2: i32) -> (i32, i32) {
    %c0_i32 = arith.constant 0 : i32
    %c0_i32_0 = arith.constant 0 : i32
    return %c0_i32, %arg1 : i32, i32
  }
  func.func @transform_3(%arg0: i32, %arg1: i32, %arg2: i32) -> (i32, i32) {
    %c0_i32 = arith.constant 0 : i32
    return %arg0, %arg1 : i32, i32
  }
}

module attributes {stable_mosaic.version = 11 : i64} {
  func.func @_matmul_bias_act_kernel(%arg0: i32, %arg1: i32, %arg2: i32, %arg3: memref<256x32xf32, #tpu.memory_space<vmem>>, %arg4: memref<32x8xf32, #tpu.memory_space<vmem>>, %arg5: memref<1x8xf32, #tpu.memory_space<vmem>>, %arg6: memref<256x8xf32, #tpu.memory_space<vmem>>, %arg7: memref<256x8xf32, #tpu.memory_space<vmem>>) attributes {dimension_semantics = [#tpu.dimension_semantics<parallel>, #tpu.dimension_semantics<parallel>, #tpu.dimension_semantics<arbitrary>], iteration_bounds = array<i64: 2, 1, 1>, scalar_prefetch = 0 : i64, scratch_operands = 1 : i64, tpu.core_type = #tpu.core_type<tc>, window_params = [{transform_indices = @transform_0, window_bounds = array<i64: 256, 32>}, {transform_indices = @transform_1, window_bounds = array<i64: 32, 8>}, {transform_indices = @transform_2, window_bounds = array<i64: 1, 8>}, {transform_indices = @transform_3, window_bounds = array<i64: 256, 8>}]} {
    %c0_i32 = arith.constant 0 : i32
    %0 = arith.cmpi eq, %arg2, %c0_i32 : i32
    %1 = arith.extui %0 : i1 to i32
    %c0_i32_0 = arith.constant 0 : i32
    %2 = arith.cmpi ne, %1, %c0_i32_0 : i32
    scf.if %2 {
      %cst_10 = arith.constant 0.000000e+00 : f32
      %12 = vector.broadcast %cst_10 : f32 to vector<256x8xf32>
      %c0_11 = arith.constant 0 : index
      %c0_12 = arith.constant 0 : index
      %13 = vector.load %arg7[%c0_11, %c0_12] : memref<256x8xf32, #tpu.memory_space<vmem>>, vector<256x8xf32>
      tpu.vector_store %arg7[%c0_11, %c0_12], %12 {strides = array<i32>} : memref<256x8xf32, #tpu.memory_space<vmem>>, vector<256x8xf32>,
    } else {
    }
    %c0 = arith.constant 0 : index
    %c0_1 = arith.constant 0 : index
    %3 = vector.load %arg7[%c0, %c0_1] : memref<256x8xf32, #tpu.memory_space<vmem>>, vector<256x8xf32>
    %c0_2 = arith.constant 0 : index
    %c0_3 = arith.constant 0 : index
    %4 = vector.load %arg3[%c0_2, %c0_3] : memref<256x32xf32, #tpu.memory_space<vmem>>, vector<256x32xf32>
    %c0_4 = arith.constant 0 : index
    %c0_5 = arith.constant 0 : index
    %5 = vector.load %arg4[%c0_4, %c0_5] : memref<32x8xf32, #tpu.memory_space<vmem>>, vector<32x8xf32>
    %cst = arith.constant dense<0.000000e+00> : vector<256x8xf32>
    %6 = tpu.matmul %4, %5, %cst {dimension_numbers = #tpu.dot_dimension_numbers<[1], [0], [0], [1], [0, 0, 1, 1], [], []>} : vector<256x32xf32>, vector<32x8xf32>, vector<256x8xf32> -> vector<256x8xf32>
    %7 = arith.addf %3, %6 : vector<256x8xf32>
    %c0_6 = arith.constant 0 : index
    %c0_7 = arith.constant 0 : index
    %8 = vector.load %arg7[%c0_6, %c0_7] : memref<256x8xf32, #tpu.memory_space<vmem>>, vector<256x8xf32>
    tpu.vector_store %arg7[%c0_6, %c0_7], %7 {strides = array<i32>} : memref<256x8xf32, #tpu.memory_space<vmem>>, vector<256x8xf32>,
    %c0_i32_8 = arith.constant 0 : i32
    %9 = arith.cmpi eq, %arg2, %c0_i32_8 : i32
    %10 = arith.extui %9 : i1 to i32
    %c0_i32_9 = arith.constant 0 : i32
    %11 = arith.cmpi ne, %10, %c0_i32_9 : i32
    scf.if %11 {
      %c0_10 = arith.constant 0 : index
      %c0_11 = arith.constant 0 : index
      %12 = vector.load %arg7[%c0_10, %c0_11] : memref<256x8xf32, #tpu.memory_space<vmem>>, vector<256x8xf32>
      %c0_12 = arith.constant 0 : index
      %c0_13 = arith.constant 0 : index
      %13 = vector.load %arg5[%c0_12, %c0_13] : memref<1x8xf32, #tpu.memory_space<vmem>>, vector<1x8xf32>
      %14 = vector.broadcast %13 : vector<1x8xf32> to vector<256x8xf32>
      %15 = arith.addf %12, %14 : vector<256x8xf32>
      %cst_14 = arith.constant 0.000000e+00 : f32
      %16 = vector.broadcast %cst_14 : f32 to vector<256x8xf32>
      %17 = arith.maximumf %15, %16 : vector<256x8xf32>
      %c0_15 = arith.constant 0 : index
      %c0_16 = arith.constant 0 : index
      %18 = vector.load %arg6[%c0_15, %c0_16] : memref<256x8xf32, #tpu.memory_space<vmem>>, vector<256x8xf32>
      tpu.vector_store %arg6[%c0_15, %c0_16], %17 {strides = array<i32>} : memref<256x8xf32, #tpu.memory_space<vmem>>, vector<256x8xf32>,
    } else {
    }
    return
  }
  func.func @transform_0(%arg0: i32, %arg1: i32, %arg2: i32) -> (i32, i32) {
    %c0_i32 = arith.constant 0 : i32
    return %arg0, %arg2 : i32, i32
  }
  func.func @transform_1(%arg0: i32, %arg1: i32, %arg2: i32) -> (i32, i32) {
    %c0_i32 = arith.constant 0 : i32
    return %arg2, %arg1 : i32, i32
  }
  func.func @transform_2(%arg0: i32, %arg1: i32, %arg2: i32) -> (i32, i32) {
    %c0_i32 = arith.constant 0 : i32
    %c0_i32_0 = arith.constant 0 : i32
    return %c0_i32, %arg1 : i32, i32
  }
  func.func @transform_3(%arg0: i32, %arg1: i32, %arg2: i32) -> (i32, i32) {
    %c0_i32 = arith.constant 0 : i32
    return %arg0, %arg1 : i32, i32
  }
}

</mosaic_0001>

<bundles_post_ra>
// kernel: _aspp_forward.7
= control target key start
LH: loop header
LB: loop body
LE: loop exit
PB: predicated region body
PF: predicated region fallthrough
CT: control target
= control target key end

     0   :  { %s1231_s12 = smov 0   ;;  %s1233_s13 = smov 0   ;;  %s1536_s0 = inlined_call_operand.vmem [shape: f32[512,36], index: 0, kind: input, shape index: {}]   ;;  %s1537_s1 = inlined_call_operand.vmem [shape: f32[36,8], index: 1, kind: input, shape index: {}]   ;;  %s1538_s2 = inlined_call_operand.vmem [shape: f32[1,8], index: 2, kind: input, shape index: {}]   ;;  %s1539_s3 = inlined_call_operand.vmem [shape: f32[512,8], index: 3, kind: output, shape index: {}]  }
   0x1   :  { %s1235_s14 = smov 0  }
   0x2 LB: > { %s32_s15 = sadd.s32 1, %s1204_s13  ;;  %p1011_p0 = scmp.ge.s32.totalorder %s1208_s14, 1  ;;  %s1208_s14 = sphi %s1235_s14, %s13_s14   ;;  %s1204_s13 = sphi %s1233_s13, %s1542_s13   ;;  %s1200_s12 = sphi %s1231_s12, %s1541_s12  }
   0x3   : > { %p34_p1 = scmp.ge.s32.totalorder %s32_s15, 2  ;;  %p188_p2 = scmp.lt.s32.totalorder %s1208_s14, 3 }
   0x5   : > { %s1544_s15 = smov (%p34_p1, %s32_s15), 0  ;;  %p189_p3 = pnand %p1011_p0, %p188_p2 }
   0x6   : > { %v360_v0 = vld [vmem:[%s1537_s1] sm:$0xff] (!%p189_p3)  ;;  %v361_v1 = vld [vmem:[%s1537_s1 + $0x8] sm:$0xff] (!%p189_p3)  ;;  %v362_v2 = vld [vmem:[%s1537_s1 + $0x10] sm:$0xff] (!%p189_p3)  ;;  %s1012_s22 = sshll.u32 (!%p189_p3), %s1200_s12, 5  ;;  %vm263_vm0 = vcmask (!%p189_p3), 64512   ;;  %v1210_v6 = vmov (!%p189_p3), 0.0  }
   0x7   : > { %192 = sbr.rel (%p189_p3) target bundleno = 278 (0x116), region = 32  ;;  %v1147_v3 = vpack.c.bf16 (!%p189_p3), %v361_v1, %v360_v0  ;;  %v363_v4 = vld [vmem:[%s1537_s1 + $0x18] sm:$0xff] (!%p189_p3)  ;;  %p1266_p4 = scmp.lt.s32.totalorder (!%p189_p3), %s1012_s22, 63  ;;  %265 = vst.msk [vmem:[#allocation2 + $0x8] sm:$0xff] (!%p189_p3), %vm263_vm0, %v1210_v6  ;;  %264 = vst.msk [vmem:[#allocation2] sm:$0xff] (!%p189_p3), %vm263_vm0, %v1210_v6  ;;  %vm462_vm1 = vcmask (!%p189_p3), 1043456  }
   0x8   : > { %v1151_v5 = vpack.c.bf16 (!%p189_p3), %v363_v4, %v362_v2  ;;  %266 = vst.msk [vmem:[#allocation2 + $0x10] sm:$0xff] (!%p189_p3), %vm263_vm0, %v1210_v6  ;;  %267 = vst.msk [vmem:[#allocation2 + $0x18] sm:$0xff] (!%p189_p3), %vm263_vm0, %v1210_v6  ;;  %v364_v7 = vld [vmem:[%s1537_s1 + $0x20] sm:$0xf] (!%p189_p3)  ;;  %vm365_vm2 = vcmask (!%p189_p3), 293888  }
   0x9   : > { %268 = vst.msk [vmem:[#allocation2 + $0x20] sm:$0xff] (!%p189_p3), %vm263_vm0, %v1210_v6  ;;  %269 = vst.msk [vmem:[#allocation2 + $0x28] sm:$0xff] (!%p189_p3), %vm263_vm0, %v1210_v6  ;;  %1148 = vmatprep.subr.bf16.mxu0 (!%p189_p3), %v1147_v3  ;;  %1155 = vmatprep.subr.bf16.mxu1 (!%p189_p3), %v1147_v3  ;;  %v1396_v4 = vld [vmem:[%s1538_s2] ss:$0 sm:$0xff] (!%p189_p3) }
   0xa   : > { %270 = vst.msk [vmem:[#allocation2 + $0x30] sm:$0xff] (!%p189_p3), %vm263_vm0, %v1210_v6  ;;  %271 = vst.msk [vmem:[#allocation2 + $0x38] sm:$0xff] (!%p189_p3), %vm263_vm0, %v1210_v6  ;;  %1150 = vmatpush3.bf16.msra.mxu0 (!%p189_p3), %v1147_v3  ;;  %1158 = vmatpush3.bf16.msra.mxu1 (!%p189_p3), %v1147_v3 }
   0xb   : > { %272 = vst.msk [vmem:[#allocation2 + $0x40] sm:$0xff] (!%p189_p3), %vm263_vm0, %v1210_v6  ;;  %273 = vst.msk [vmem:[#allocation2 + $0x48] sm:$0xff] (!%p189_p3), %vm263_vm0, %v1210_v6  ;;  %1152 = vmatprep.subr.bf16.mxu0 (!%p189_p3), %v1151_v5  ;;  %1156 = vmatprep.subr.bf16.mxu1 (!%p189_p3), %v1151_v5 }
   0xc   : > { %274 = vst.msk [vmem:[#allocation2 + $0x50] sm:$0xff] (!%p189_p3), %vm263_vm0, %v1210_v6  ;;  %275 = vst.msk [vmem:[#allocation2 + $0x58] sm:$0xff] (!%p189_p3), %vm263_vm0, %v1210_v6 }
   0xd   : > { %276 = vst.msk [vmem:[#allocation2 + $0x60] sm:$0xff] (!%p189_p3), %vm263_vm0, %v1210_v6  ;;  %277 = vst.msk [vmem:[#allocation2 + $0x68] sm:$0xff] (!%p189_p3), %vm263_vm0, %v1210_v6 }
   0xe   : > { %278 = vst.msk [vmem:[#allocation2 + $0x70] sm:$0xff] %vm263_vm0, %v1210_v6  ;;  %279 = vst.msk [vmem:[#allocation2 + $0x78] sm:$0xff] %vm263_vm0, %v1210_v6  ;;  %s1546_s22 = smov (!%p1266_p4, %s1012_s22), 63  ;;  %1154 = vmatpush3.bf16.msra.mxu0 %v1151_v5  ;;  %1159 = vmatpush3.bf16.msra.mxu1 %v1151_v5  ;;  %v297_v40 = vld [vmem:[#allocation2 + $0x8] sm:$0xff]  ;;  %v296_v42 = vld [vmem:[#allocation2] sm:$0xff] }
   0xf   : > { %280 = vst.msk [vmem:[#allocation2 + $0x80] sm:$0xff] %vm263_vm0, %v1210_v6  ;;  %281 = vst.msk [vmem:[#allocation2 + $0x88] sm:$0xff] %vm263_vm0, %v1210_v6  ;;  %s1013_s26 = sshll.u32 %s1546_s22, 3  ;;  %1097 = vmatprep.subr.msk.mxu0 %vm462_vm1, %v364_v7  ;;  %1157 = vmatprep.subr.msk.mxu1 %vm462_vm1, %v364_v7  ;;  %v299_v52 = vld [vmem:[#allocation2 + $0x18] sm:$0xff]  ;;  %v298_v54 = vld [vmem:[#allocation2 + $0x10] sm:$0xff] }
  0x10   : > { %282 = vst.msk [vmem:[#allocation2 + $0x90] sm:$0xff] %vm263_vm0, %v1210_v6  ;;  %283 = vst.msk [vmem:[#allocation2 + $0x98] sm:$0xff] %vm263_vm0, %v1210_v6  ;;  %s1317_s4 = scalar_lea.vmem %s1536_s0, %s1013_s26  ;;  %v301_v0 = vld [vmem:[#allocation2 + $0x28] sm:$0xff]  ;;  %v300_v2 = vld [vmem:[#allocation2 + $0x20] sm:$0xff]  ;;  %s1409_s9 = scalar_lea.vmem %s1539_s3, %s1013_s26 }
  0x11   : > { %284 = vst.msk [vmem:[#allocation2 + $0xa0] sm:$0xff] %vm263_vm0, %v1210_v6  ;;  %285 = vst.msk [vmem:[#allocation2 + $0xa8] sm:$0xff] %vm263_vm0, %v1210_v6  ;;  %v328_v8 = vld [vmem:[%s1317_s4] sm:$0xff]  ;;  %v329_v10 = vld [vmem:[%s1317_s4 + $0x8] sm:$0xff] }
  0x12   : > { %286 = vst.msk [vmem:[#allocation2 + $0xb0] sm:$0xff] %vm263_vm0, %v1210_v6  ;;  %287 = vst.msk [vmem:[#allocation2 + $0xb8] sm:$0xff] %vm263_vm0, %v1210_v6  ;;  %v344_v9 = vld [vmem:[%s1317_s4 + $0x80] sm:$0xff]  ;;  %1099 = vmatprep.mubr.msk.f32.mxu0 %vm365_vm2, %v328_v8  ;;  %v345_v11 = vld [vmem:[%s1317_s4 + $0x88] sm:$0xff]  ;;  %1098 = vmatpush3.msk.msra.mxu0 %vm462_vm1, %v364_v7 }
  0x13   : > { %288 = vst.msk [vmem:[#allocation2 + $0xc0] sm:$0xff] %vm263_vm0, %v1210_v6  ;;  %289 = vst.msk [vmem:[#allocation2 + $0xc8] sm:$0xff] %vm263_vm0, %v1210_v6  ;;  %1123 = vmatprep.mubr.msk.f32.mxu1 %vm365_vm2, %v344_v9  ;;  %v330_v12 = vld [vmem:[%s1317_s4 + $0x10] sm:$0xff]  ;;  %1160 = vmatpush3.msk.msra.mxu1 %vm462_vm1, %v364_v7  ;;  %v331_v14 = vld [vmem:[%s1317_s4 + $0x18] sm:$0xff] }
  0x14   : > { %290 = vst.msk [vmem:[#allocation2 + $0xd0] sm:$0xff] %vm263_vm0, %v1210_v6  ;;  %291 = vst.msk [vmem:[#allocation2 + $0xd8] sm:$0xff] %vm263_vm0, %v1210_v6  ;;  %v346_v13 = vld [vmem:[%s1317_s4 + $0x90] sm:$0xff]  ;;  %1100 = vmatmul.mubr.msk.f32.vlgmr.msra.gmra.mrb[0].mxu0 %vm365_vm2, %v329_v10  ;;  %1124 = vmatmul.mubr.msk.f32.vlgmr.msra.gmra.mrb[0].mxu1 %vm365_vm2, %v345_v11  ;;  %v347_v15 = vld [vmem:[%s1317_s4 + $0x98] sm:$0xff] }
  0x15   : > { %292 = vst.msk [vmem:[#allocation2 + $0xe0] sm:$0xff] %vm263_vm0, %v1210_v6  ;;  %293 = vst.msk [vmem:[#allocation2 + $0xe8] sm:$0xff] %vm263_vm0, %v1210_v6  ;;  %1102 = vmatprep.mubr.msk.f32.mxu0 %vm365_vm2, %v330_v12  ;;  %1126 = vmatprep.mubr.msk.f32.mxu1 %vm365_vm2, %v346_v13  ;;  %v332_v16 = vld [vmem:[%s1317_s4 + $0x20] sm:$0xff]  ;;  %v333_v18 = vld [vmem:[%s1317_s4 + $0x28] sm:$0xff] }
  0x16   : > { %294 = vst.msk [vmem:[#allocation2 + $0xf0] sm:$0xff] %vm263_vm0, %v1210_v6  ;;  %295 = vst.msk [vmem:[#allocation2 + $0xf8] sm:$0xff] %vm263_vm0, %v1210_v6  ;;  %v348_v17 = vld [vmem:[%s1317_s4 + $0xa0] sm:$0xff]  ;;  %v349_v19 = vld [vmem:[%s1317_s4 + $0xa8] sm:$0xff] }
  0x17   : > { %v334_v20 = vld [vmem:[%s1317_s4 + $0x30] sm:$0xff]  ;;  %v335_v22 = vld [vmem:[%s1317_s4 + $0x38] sm:$0xff]  ;;  %v336_v24 = vld [vmem:[%s1317_s4 + $0x40] sm:$0xff] }
  0x18   : > { %1103 = vmatmul.mubr.msk.f32.gmra.mrb[2].mxu0 %vm365_vm2, %v331_v14  ;;  %1127 = vmatmul.mubr.msk.f32.gmra.mrb[2].mxu1 %vm365_vm2, %v347_v15  ;;  %v350_v21 = vld [vmem:[%s1317_s4 + $0xb0] sm:$0xff]  ;;  %v351_v23 = vld [vmem:[%s1317_s4 + $0xb8] sm:$0xff]  ;;  %v352_v25 = vld [vmem:[%s1317_s4 + $0xc0] sm:$0xff] }
  0x19   : > { %1105 = vmatprep.mubr.msk.f32.mxu0 %vm365_vm2, %v332_v16  ;;  %1129 = vmatprep.mubr.msk.f32.mxu1 %vm365_vm2, %v348_v17  ;;  %v337_v26 = vld [vmem:[%s1317_s4 + $0x48] sm:$0xff]  ;;  %v338_v28 = vld [vmem:[%s1317_s4 + $0x50] sm:$0xff]  ;;  %v339_v30 = vld [vmem:[%s1317_s4 + $0x58] sm:$0xff] }
  0x1a   : > { %v353_v27 = vld [vmem:[%s1317_s4 + $0xc8] sm:$0xff]  ;;  %v354_v29 = vld [vmem:[%s1317_s4 + $0xd0] sm:$0xff]  ;;  %v355_v31 = vld [vmem:[%s1317_s4 + $0xd8] sm:$0xff] }
  0x1b   : > { %v340_v32 = vld [vmem:[%s1317_s4 + $0x60] sm:$0xff]  ;;  %v341_v34 = vld [vmem:[%s1317_s4 + $0x68] sm:$0xff]  ;;  %v342_v36 = vld [vmem:[%s1317_s4 + $0x70] sm:$0xff] }
  0x1c   : > { %1106 = vmatmul.mubr.msk.f32.gmra.mrb[4].mxu0 %vm365_vm2, %v333_v18  ;;  %1130 = vmatmul.mubr.msk.f32.gmra.mrb[4].mxu1 %vm365_vm2, %v349_v19  ;;  %v356_v33 = vld [vmem:[%s1317_s4 + $0xe0] sm:$0xff]  ;;  %v357_v35 = vld [vmem:[%s1317_s4 + $0xe8] sm:$0xff]  ;;  %v358_v37 = vld [vmem:[%s1317_s4 + $0xf0] sm:$0xff] }
  0x1d   : > { %1108 = vmatprep.mubr.msk.f32.mxu0 %vm365_vm2, %v334_v20  ;;  %1132 = vmatprep.mubr.msk.f32.mxu1 %vm365_vm2, %v350_v21  ;;  %v343_v38 = vld [vmem:[%s1317_s4 + $0x78] sm:$0xff]  ;;  %v313_v41 = vld [vmem:[#allocation2 + $0x88] sm:$0xff]  ;;  %v312_v43 = vld [vmem:[#allocation2 + $0x80] sm:$0xff] }
  0x1e   : > { %v359_v39 = vld [vmem:[%s1317_s4 + $0xf8] sm:$0xff]  ;;  %v314_v55 = vld [vmem:[#allocation2 + $0x90] sm:$0xff]  ;;  %v317_v1 = vld [vmem:[#allocation2 + $0xa8] sm:$0xff] }
  0x1f   : > { %v315_v53 = vld [vmem:[#allocation2 + $0x98] sm:$0xff]  ;;  %v316_v3 = vld [vmem:[#allocation2 + $0xa0] sm:$0xff]  ;;  %v302_v17 = vld [vmem:[#allocation2 + $0x30] sm:$0xff] }
  0x20   : > { %1109 = vmatmul.mubr.msk.f32.gmra.mrb[6].mxu0 %vm365_vm2, %v335_v22  ;;  %1133 = vmatmul.mubr.msk.f32.gmra.mrb[6].mxu1 %vm365_vm2, %v351_v23  ;;  %v303_v11 = vld [vmem:[#allocation2 + $0x38] sm:$0xff]  ;;  %v318_v22 = vld [vmem:[#allocation2 + $0xb0] sm:$0xff] }
  0x21   : > { %1111 = vmatprep.mubr.msk.f32.mxu0 %vm365_vm2, %v336_v24  ;;  %1135 = vmatprep.mubr.msk.f32.mxu1 %vm365_vm2, %v352_v25  ;;  %v319_v12 = vld [vmem:[#allocation2 + $0xb8] sm:$0xff] }
  0x24   : > { %1112 = vmatmul.mubr.msk.f32.gmra.mrb[8].mxu0 %vm365_vm2, %v337_v26  ;;  %1136 = vmatmul.mubr.msk.f32.gmra.mrb[8].mxu1 %vm365_vm2, %v353_v27 }
  0x25   : > { %1114 = vmatprep.mubr.msk.f32.mxu0 %vm365_vm2, %v338_v28  ;;  %1138 = vmatprep.mubr.msk.f32.mxu1 %vm365_vm2, %v354_v29 }
  0x28   : > { %1115 = vmatmul.mubr.msk.f32.gmra.mrb[10].mxu0 %vm365_vm2, %v339_v30  ;;  %1139 = vmatmul.mubr.msk.f32.gmra.mrb[10].mxu1 %vm365_vm2, %v355_v31 }
  0x29   : > { %1117 = vmatprep.mubr.msk.f32.mxu0 %vm365_vm2, %v340_v32  ;;  %1141 = vmatprep.mubr.msk.f32.mxu1 %vm365_vm2, %v356_v33  ;;  %v305_v33 = vld [vmem:[#allocation2 + $0x48] sm:$0xff] }
  0x2c   : > { %1118 = vmatmul.mubr.msk.f32.gmra.mrb[12].mxu0 %vm365_vm2, %v341_v34  ;;  %1142 = vmatmul.mubr.msk.f32.gmra.mrb[12].mxu1 %vm365_vm2, %v357_v35  ;;  %v321_v34 = vld [vmem:[#allocation2 + $0xc8] sm:$0xff] }
  0x2d   : > { %1120 = vmatprep.mubr.msk.f32.mxu0 %vm365_vm2, %v342_v36  ;;  %1144 = vmatprep.mubr.msk.f32.mxu1 %vm365_vm2, %v358_v37 }
  0x30   : > { %1121 = vmatmul.mubr.msk.f32.gmra.mrb[14].mxu0 %vm365_vm2, %v343_v38  ;;  %1145 = vmatmul.mubr.msk.f32.gmra.mrb[14].mxu1 %vm365_vm2, %v359_v39 }
  0xe7   : > { %v1101_v44 = vpop.f32.mrb[0].mxu0  ;;  %v1125_v45 = vpop.f32.mrb[0].mxu1 }
  0xe8   : > { %v692_v46 = vadd.f32 %v1101_v44, %v297_v40  ;;  %v708_v47 = vadd.f32 %v1125_v45, %v313_v41  ;;  %v532_v48 = vpop.f32.mrb[1].mxu0  ;;  %v612_v49 = vpop.f32.mrb[1].mxu1  ;;  %v304_v41 = vld [vmem:[#allocation2 + $0x40] sm:$0xff] }
  0xe9   : > { %v691_v50 = vadd.f32 %v532_v48, %v296_v42  ;;  %v707_v51 = vadd.f32 %v612_v49, %v312_v43 }
  0xea   : > { %725 = vst.msk [vmem:[#allocation2 + $0x8] sm:$0xff] %vm263_vm0, %v692_v46  ;;  %741 = vst.msk [vmem:[#allocation2 + $0x88] sm:$0xff] %vm263_vm0, %v708_v47  ;;  %v320_v46 = vld [vmem:[#allocation2 + $0xc0] sm:$0xff] }
  0xeb   : > { %724 = vst.msk [vmem:[#allocation2] sm:$0xff] %vm263_vm0, %v691_v50  ;;  %740 = vst.msk [vmem:[#allocation2 + $0x80] sm:$0xff] %vm263_vm0, %v707_v51  ;;  %v1104_v56 = vpop.f32.mrb[2].mxu0  ;;  %v1128_v57 = vpop.f32.mrb[2].mxu1 }
  0xec   : > { %v694_v58 = vadd.f32 %v1104_v56, %v299_v52  ;;  %v710_v59 = vadd.f32 %v1128_v57, %v315_v53  ;;  %v542_v60 = vpop.f32.mrb[3].mxu0  ;;  %v622_v61 = vpop.f32.mrb[3].mxu1  ;;  %v307_v57 = vld [vmem:[#allocation2 + $0x58] sm:$0xff] }
  0xed   : > { %v693_v62 = vadd.f32 %v542_v60, %v298_v54  ;;  %v709_v63 = vadd.f32 %v622_v61, %v314_v55 }
  0xee   : > { %727 = vst.msk [vmem:[#allocation2 + $0x18] sm:$0xff] %vm263_vm0, %v694_v58  ;;  %743 = vst.msk [vmem:[#allocation2 + $0x98] sm:$0xff] %vm263_vm0, %v710_v59  ;;  %v323_v58 = vld [vmem:[#allocation2 + $0xd8] sm:$0xff] }
  0xef   : > { %726 = vst.msk [vmem:[#allocation2 + $0x10] sm:$0xff] %vm263_vm0, %v693_v62  ;;  %742 = vst.msk [vmem:[#allocation2 + $0x90] sm:$0xff] %vm263_vm0, %v709_v63  ;;  %v1107_v5 = vpop.f32.mrb[4].mxu0  ;;  %v1131_v6 = vpop.f32.mrb[4].mxu1 }
  0xf0   : > { %v696_v7 = vadd.f32 %v1107_v5, %v301_v0  ;;  %v712_v8 = vadd.f32 %v1131_v6, %v317_v1  ;;  %v552_v9 = vpop.f32.mrb[5].mxu0  ;;  %v632_v10 = vpop.f32.mrb[5].mxu1  ;;  %v306_v1 = vld [vmem:[#allocation2 + $0x50] sm:$0xff] }
  0xf1   : > { %v760_v13 = vld [vmem:[#allocation2 + $0x8] sm:$0xff]  ;;  %v695_v15 = vadd.f32 %v552_v9, %v300_v2  ;;  %v711_v16 = vadd.f32 %v632_v10, %v316_v3 }
  0xf2   : > { %v776_v14 = vld [vmem:[#allocation2 + $0x88] sm:$0xff]  ;;  %v799_v18 = vadd.f32 %v1396_v4, %v760_v13  ;;  %v759_v20 = vld [vmem:[#allocation2] sm:$0xff]  ;;  %729 = vst.msk [vmem:[#allocation2 + $0x28] sm:$0xff] %vm263_vm0, %v696_v7  ;;  %745 = vst.msk [vmem:[#allocation2 + $0xa8] sm:$0xff] %vm263_vm0, %v712_v8 }
  0xf3   : > { %v815_v19 = vadd.f32 %v1396_v4, %v776_v14  ;;  %v775_v21 = vld [vmem:[#allocation2 + $0x80] sm:$0xff]  ;;  %v798_v23 = vadd.f32 %v1396_v4, %v759_v20  ;;  %728 = vst.msk [vmem:[#allocation2 + $0x20] sm:$0xff] %vm263_vm0, %v695_v15  ;;  %744 = vst.msk [vmem:[#allocation2 + $0xa0] sm:$0xff] %vm263_vm0, %v711_v16  ;;  %v1110_v25 = vpop.f32.mrb[6].mxu0  ;;  %v1134_v26 = vpop.f32.mrb[6].mxu1  ;;  %v322_v7 = vld [vmem:[#allocation2 + $0xd0] sm:$0xff] }
  0xf4   : > { %v814_v24 = vadd.f32 %v1396_v4, %v775_v21  ;;  %v831_v27 = vmax.f32 %v799_v18, 0.0  ;;  %v698_v29 = vadd.f32 %v1110_v25, %v303_v11  ;;  %v714_v30 = vadd.f32 %v1134_v26, %v319_v12  ;;  %v562_v31 = vpop.f32.mrb[7].mxu0  ;;  %v642_v32 = vpop.f32.mrb[7].mxu1  ;;  %v309_v18 = vld [vmem:[#allocation2 + $0x68] sm:$0xff]  ;;  %v308_v26 = vld [vmem:[#allocation2 + $0x60] sm:$0xff] }
  0xf5   : > { %v847_v28 = vmax.f32 %v815_v19, 0.0  ;;  %v830_v35 = vmax.f32 %v798_v23, 0.0  ;;  %v762_v37 = vld [vmem:[#allocation2 + $0x18] sm:$0xff]  ;;  %v697_v39 = vadd.f32 %v562_v31, %v302_v17  ;;  %v713_v40 = vadd.f32 %v642_v32, %v318_v22  ;;  %v325_v19 = vld [vmem:[#allocation2 + $0xe8] sm:$0xff]  ;;  %v324_v31 = vld [vmem:[#allocation2 + $0xe0] sm:$0xff] }
  0xf6   : > { %v846_v36 = vmax.f32 %v814_v24, 0.0  ;;  %v778_v38 = vld [vmem:[#allocation2 + $0x98] sm:$0xff]  ;;  %863 = vst.msk [vmem:[%s1409_s9 + $0x8] sm:$0xff] %vm263_vm0, %v831_v27  ;;  %v801_v42 = vadd.f32 %v1396_v4, %v762_v37  ;;  %v761_v44 = vld [vmem:[#allocation2 + $0x10] sm:$0xff]  ;;  %731 = vst.msk [vmem:[#allocation2 + $0x38] sm:$0xff] %vm263_vm0, %v698_v29 }
  0xf7   : > { %879 = vst.msk [vmem:[%s1409_s9 + $0x88] sm:$0xff] %vm263_vm0, %v847_v28  ;;  %v817_v43 = vadd.f32 %v1396_v4, %v778_v38  ;;  %v777_v45 = vld [vmem:[#allocation2 + $0x90] sm:$0xff]  ;;  %747 = vst.msk [vmem:[#allocation2 + $0xb8] sm:$0xff] %vm263_vm0, %v714_v30  ;;  %v800_v47 = vadd.f32 %v1396_v4, %v761_v44  ;;  %v1113_v49 = vpop.f32.mrb[8].mxu0  ;;  %v1137_v50 = vpop.f32.mrb[8].mxu1 }
  0xf8   : > { %862 = vst.msk [vmem:[%s1409_s9] sm:$0xff] %vm263_vm0, %v830_v35  ;;  %878 = vst.msk [vmem:[%s1409_s9 + $0x80] sm:$0xff] %vm263_vm0, %v846_v36  ;;  %v816_v48 = vadd.f32 %v1396_v4, %v777_v45  ;;  %v833_v51 = vmax.f32 %v801_v42, 0.0  ;;  %v700_v53 = vadd.f32 %v1113_v49, %v305_v33  ;;  %v716_v54 = vadd.f32 %v1137_v50, %v321_v34  ;;  %v572_v55 = vpop.f32.mrb[9].mxu0  ;;  %v652_v56 = vpop.f32.mrb[9].mxu1  ;;  %v311_v42 = vld [vmem:[#allocation2 + $0x78] sm:$0xff] }
  0xf9   : > { %730 = vst.msk [vmem:[#allocation2 + $0x30] sm:$0xff] %vm263_vm0, %v697_v39  ;;  %746 = vst.msk [vmem:[#allocation2 + $0xb0] sm:$0xff] %vm263_vm0, %v713_v40  ;;  %v849_v52 = vmax.f32 %v817_v43, 0.0  ;;  %v832_v59 = vmax.f32 %v800_v47, 0.0  ;;  %v764_v61 = vld [vmem:[#allocation2 + $0x28] sm:$0xff]  ;;  %v699_v63 = vadd.f32 %v572_v55, %v304_v41  ;;  %v715_v0 = vadd.f32 %v652_v56, %v320_v46  ;;  %v327_v43 = vld [vmem:[#allocation2 + $0xf8] sm:$0xff] }
  0xfa   : > { %v848_v60 = vmax.f32 %v816_v48, 0.0  ;;  %v780_v62 = vld [vmem:[#allocation2 + $0xa8] sm:$0xff]  ;;  %865 = vst.msk [vmem:[%s1409_s9 + $0x18] sm:$0xff] %vm263_vm0, %v833_v51  ;;  %v803_v2 = vadd.f32 %v1396_v4, %v764_v61  ;;  %v763_v5 = vld [vmem:[#allocation2 + $0x20] sm:$0xff]  ;;  %733 = vst.msk [vmem:[#allocation2 + $0x48] sm:$0xff] %vm263_vm0, %v700_v53 }
  0xfb   : > { %881 = vst.msk [vmem:[%s1409_s9 + $0x98] sm:$0xff] %vm263_vm0, %v849_v52  ;;  %v819_v3 = vadd.f32 %v1396_v4, %v780_v62  ;;  %v779_v6 = vld [vmem:[#allocation2 + $0xa0] sm:$0xff]  ;;  %749 = vst.msk [vmem:[#allocation2 + $0xc8] sm:$0xff] %vm263_vm0, %v716_v54  ;;  %v802_v8 = vadd.f32 %v1396_v4, %v763_v5  ;;  %v1116_v10 = vpop.f32.mrb[10].mxu0  ;;  %v1140_v11 = vpop.f32.mrb[10].mxu1  ;;  %v310_v50 = vld [vmem:[#allocation2 + $0x70] sm:$0xff] }
  0xfc   : > { %864 = vst.msk [vmem:[%s1409_s9 + $0x10] sm:$0xff] %vm263_vm0, %v832_v59  ;;  %880 = vst.msk [vmem:[%s1409_s9 + $0x90] sm:$0xff] %vm263_vm0, %v848_v60  ;;  %v818_v9 = vadd.f32 %v1396_v4, %v779_v6  ;;  %v835_v12 = vmax.f32 %v803_v2, 0.0  ;;  %v702_v14 = vadd.f32 %v1116_v10, %v307_v57  ;;  %v718_v15 = vadd.f32 %v1140_v11, %v323_v58  ;;  %v582_v16 = vpop.f32.mrb[11].mxu0  ;;  %v662_v17 = vpop.f32.mrb[11].mxu1  ;;  %v326_v55 = vld [vmem:[#allocation2 + $0xf0] sm:$0xff] }
  0xfd   : > { %732 = vst.msk [vmem:[#allocation2 + $0x40] sm:$0xff] %vm263_vm0, %v699_v63  ;;  %748 = vst.msk [vmem:[#allocation2 + $0xc0] sm:$0xff] %vm263_vm0, %v715_v0  ;;  %v851_v13 = vmax.f32 %v819_v3, 0.0  ;;  %v834_v20 = vmax.f32 %v802_v8, 0.0  ;;  %v766_v22 = vld [vmem:[#allocation2 + $0x38] sm:$0xff]  ;;  %v701_v24 = vadd.f32 %v582_v16, %v306_v1  ;;  %v717_v25 = vadd.f32 %v662_v17, %v322_v7 }
  0xfe   : > { %v850_v21 = vmax.f32 %v818_v9, 0.0  ;;  %v782_v23 = vld [vmem:[#allocation2 + $0xb8] sm:$0xff]  ;;  %867 = vst.msk [vmem:[%s1409_s9 + $0x28] sm:$0xff] %vm263_vm0, %v835_v12  ;;  %v805_v27 = vadd.f32 %v1396_v4, %v766_v22  ;;  %735 = vst.msk [vmem:[#allocation2 + $0x58] sm:$0xff] %vm263_vm0, %v702_v14 }
  0xff   : > { %883 = vst.msk [vmem:[%s1409_s9 + $0xa8] sm:$0xff] %vm263_vm0, %v851_v13  ;;  %v821_v28 = vadd.f32 %v1396_v4, %v782_v23  ;;  %751 = vst.msk [vmem:[#allocation2 + $0xd8] sm:$0xff] %vm263_vm0, %v718_v15  ;;  %v1119_v34 = vpop.f32.mrb[12].mxu0  ;;  %v1143_v35 = vpop.f32.mrb[12].mxu1 }
 0x100   : > { %v765_v29 = vld [vmem:[#allocation2 + $0x30] sm:$0xff]  ;;  %866 = vst.msk [vmem:[%s1409_s9 + $0x20] sm:$0xff] %vm263_vm0, %v834_v20  ;;  %882 = vst.msk [vmem:[%s1409_s9 + $0xa0] sm:$0xff] %vm263_vm0, %v850_v21  ;;  %v837_v36 = vmax.f32 %v805_v27, 0.0  ;;  %v704_v38 = vadd.f32 %v1119_v34, %v309_v18  ;;  %v720_v39 = vadd.f32 %v1143_v35, %v325_v19  ;;  %v592_v40 = vpop.f32.mrb[13].mxu0  ;;  %v672_v41 = vpop.f32.mrb[13].mxu1 }
 0x101   : > { %v781_v30 = vld [vmem:[#allocation2 + $0xb0] sm:$0xff]  ;;  %v804_v32 = vadd.f32 %v1396_v4, %v765_v29  ;;  %734 = vst.msk [vmem:[#allocation2 + $0x50] sm:$0xff] %vm263_vm0, %v701_v24  ;;  %750 = vst.msk [vmem:[#allocation2 + $0xd0] sm:$0xff] %vm263_vm0, %v717_v25  ;;  %v853_v37 = vmax.f32 %v821_v28, 0.0  ;;  %v768_v46 = vld [vmem:[#allocation2 + $0x48] sm:$0xff]  ;;  %v703_v48 = vadd.f32 %v592_v40, %v308_v26  ;;  %v719_v49 = vadd.f32 %v672_v41, %v324_v31 }
 0x102   : > { %v820_v33 = vadd.f32 %v1396_v4, %v781_v30  ;;  %v784_v47 = vld [vmem:[#allocation2 + $0xc8] sm:$0xff]  ;;  %869 = vst.msk [vmem:[%s1409_s9 + $0x38] sm:$0xff] %vm263_vm0, %v837_v36  ;;  %v807_v51 = vadd.f32 %v1396_v4, %v768_v46  ;;  %737 = vst.msk [vmem:[#allocation2 + $0x68] sm:$0xff] %vm263_vm0, %v704_v38 }
 0x103   : > { %v836_v44 = vmax.f32 %v804_v32, 0.0  ;;  %885 = vst.msk [vmem:[%s1409_s9 + $0xb8] sm:$0xff] %vm263_vm0, %v853_v37  ;;  %v823_v52 = vadd.f32 %v1396_v4, %v784_v47  ;;  %753 = vst.msk [vmem:[#allocation2 + $0xe8] sm:$0xff] %vm263_vm0, %v720_v39  ;;  %v1122_v58 = vpop.f32.mrb[14].mxu0  ;;  %v1146_v59 = vpop.f32.mrb[14].mxu1 }
 0x104   : > { %v852_v45 = vmax.f32 %v820_v33, 0.0  ;;  %v767_v53 = vld [vmem:[#allocation2 + $0x40] sm:$0xff]  ;;  %736 = vst.msk [vmem:[#allocation2 + $0x60] sm:$0xff] %vm263_vm0, %v703_v48  ;;  %752 = vst.msk [vmem:[#allocation2 + $0xe0] sm:$0xff] %vm263_vm0, %v719_v49  ;;  %v839_v60 = vmax.f32 %v807_v51, 0.0  ;;  %v706_v62 = vadd.f32 %v1122_v58, %v311_v42  ;;  %v722_v63 = vadd.f32 %v1146_v59, %v327_v43  ;;  %v602_v0 = vpop.f32.mrb[15].mxu0 }
 0x105   : > { %v783_v54 = vld [vmem:[#allocation2 + $0xc0] sm:$0xff]  ;;  %868 = vst.msk [vmem:[%s1409_s9 + $0x30] sm:$0xff] %vm263_vm0, %v836_v44  ;;  %v806_v56 = vadd.f32 %v1396_v4, %v767_v53  ;;  %v855_v61 = vmax.f32 %v823_v52, 0.0  ;;  %v682_v1 = vpop.f32.mrb[15].mxu1  ;;  %v770_v5 = vld [vmem:[#allocation2 + $0x58] sm:$0xff]  ;;  %v705_v7 = vadd.f32 %v602_v0, %v310_v50 }
 0x106   : > { %884 = vst.msk [vmem:[%s1409_s9 + $0xb0] sm:$0xff] %vm263_vm0, %v852_v45  ;;  %v822_v57 = vadd.f32 %v1396_v4, %v783_v54  ;;  %v786_v6 = vld [vmem:[#allocation2 + $0xd8] sm:$0xff]  ;;  %v721_v8 = vadd.f32 %v682_v1, %v326_v55  ;;  %871 = vst.msk [vmem:[%s1409_s9 + $0x48] sm:$0xff] %vm263_vm0, %v839_v60  ;;  %v809_v9 = vadd.f32 %v1396_v4, %v770_v5 }
 0x107   : > { %v838_v2 = vmax.f32 %v806_v56, 0.0  ;;  %887 = vst.msk [vmem:[%s1409_s9 + $0xc8] sm:$0xff] %vm263_vm0, %v855_v61  ;;  %v825_v10 = vadd.f32 %v1396_v4, %v786_v6  ;;  %739 = vst.msk [vmem:[#allocation2 + $0x78] sm:$0xff] %vm263_vm0, %v706_v62 }
 0x108   : > { %v854_v3 = vmax.f32 %v822_v57, 0.0  ;;  %v769_v11 = vld [vmem:[#allocation2 + $0x50] sm:$0xff]  ;;  %755 = vst.msk [vmem:[#allocation2 + $0xf8] sm:$0xff] %vm263_vm0, %v722_v63  ;;  %738 = vst.msk [vmem:[#allocation2 + $0x70] sm:$0xff] %vm263_vm0, %v705_v7  ;;  %v841_v15 = vmax.f32 %v809_v9, 0.0 }
 0x109   : > { %v785_v12 = vld [vmem:[#allocation2 + $0xd0] sm:$0xff]  ;;  %870 = vst.msk [vmem:[%s1409_s9 + $0x40] sm:$0xff] %vm263_vm0, %v838_v2  ;;  %v808_v13 = vadd.f32 %v1396_v4, %v769_v11  ;;  %754 = vst.msk [vmem:[#allocation2 + $0xf0] sm:$0xff] %vm263_vm0, %v721_v8  ;;  %v857_v16 = vmax.f32 %v825_v10, 0.0  ;;  %v772_v19 = vld [vmem:[#allocation2 + $0x68] sm:$0xff] }
 0x10a   : > { %886 = vst.msk [vmem:[%s1409_s9 + $0xc0] sm:$0xff] %vm263_vm0, %v854_v3  ;;  %v824_v14 = vadd.f32 %v1396_v4, %v785_v12  ;;  %v788_v20 = vld [vmem:[#allocation2 + $0xe8] sm:$0xff]  ;;  %873 = vst.msk [vmem:[%s1409_s9 + $0x58] sm:$0xff] %vm263_vm0, %v841_v15  ;;  %v811_v21 = vadd.f32 %v1396_v4, %v772_v19 }
 0x10b   : > { %v840_v17 = vmax.f32 %v808_v13, 0.0  ;;  %889 = vst.msk [vmem:[%s1409_s9 + $0xd8] sm:$0xff] %vm263_vm0, %v857_v16  ;;  %v827_v22 = vadd.f32 %v1396_v4, %v788_v20  ;;  %v771_v23 = vld [vmem:[#allocation2 + $0x60] sm:$0xff] }
 0x10c   : > { %v856_v18 = vmax.f32 %v824_v14, 0.0  ;;  %v787_v24 = vld [vmem:[#allocation2 + $0xe0] sm:$0xff]  ;;  %v810_v25 = vadd.f32 %v1396_v4, %v771_v23  ;;  %v843_v27 = vmax.f32 %v811_v21, 0.0 }
 0x10d   : > { %872 = vst.msk [vmem:[%s1409_s9 + $0x50] sm:$0xff] %vm263_vm0, %v840_v17  ;;  %v826_v26 = vadd.f32 %v1396_v4, %v787_v24  ;;  %v859_v28 = vmax.f32 %v827_v22, 0.0 }
 0x10e   : > { %888 = vst.msk [vmem:[%s1409_s9 + $0xd0] sm:$0xff] %vm263_vm0, %v856_v18  ;;  %v842_v29 = vmax.f32 %v810_v25, 0.0  ;;  %v774_v31 = vld [vmem:[#allocation2 + $0x78] sm:$0xff]  ;;  %875 = vst.msk [vmem:[%s1409_s9 + $0x68] sm:$0xff] %vm263_vm0, %v843_v27 }
 0x10f   : > { %v858_v30 = vmax.f32 %v826_v26, 0.0  ;;  %v790_v32 = vld [vmem:[#allocation2 + $0xf8] sm:$0xff]  ;;  %891 = vst.msk [vmem:[%s1409_s9 + $0xe8] sm:$0xff] %vm263_vm0, %v859_v28  ;;  %v813_v33 = vadd.f32 %v1396_v4, %v774_v31  ;;  %v773_v35 = vld [vmem:[#allocation2 + $0x70] sm:$0xff] }
 0x110   : > { %v829_v34 = vadd.f32 %v1396_v4, %v790_v32  ;;  %v789_v36 = vld [vmem:[#allocation2 + $0xf0] sm:$0xff]  ;;  %874 = vst.msk [vmem:[%s1409_s9 + $0x60] sm:$0xff] %vm263_vm0, %v842_v29  ;;  %v812_v37 = vadd.f32 %v1396_v4, %v773_v35 }
 0x111   : > { %890 = vst.msk [vmem:[%s1409_s9 + $0xe0] sm:$0xff] %vm263_vm0, %v858_v30  ;;  %v828_v38 = vadd.f32 %v1396_v4, %v789_v36  ;;  %v845_v39 = vmax.f32 %v813_v33, 0.0 }
 0x112   : > { %v861_v40 = vmax.f32 %v829_v34, 0.0  ;;  %v844_v41 = vmax.f32 %v812_v37, 0.0 }
 0x113   : > { %v860_v42 = vmax.f32 %v828_v38, 0.0  ;;  %877 = vst.msk [vmem:[%s1409_s9 + $0x78] sm:$0xff] %vm263_vm0, %v845_v39 }
 0x114   : > { %893 = vst.msk [vmem:[%s1409_s9 + $0xf8] sm:$0xff] %vm263_vm0, %v861_v40  ;;  %876 = vst.msk [vmem:[%s1409_s9 + $0x70] sm:$0xff] %vm263_vm0, %v844_v41 }
 0x115   : > { %892 = vst.msk [vmem:[%s1409_s9 + $0xf0] sm:$0xff] %vm263_vm0, %v860_v42 }
 0x116 PF: > { %s13_s14 = sadd.s32 1, %s1208_s14   ;;  %s1541_s12 = smov %s1204_s13 }
 0x117   : > { %p10_p5 = scmp.ge.s32.totalorder %s13_s14, 4   ;;  %s1542_s13 = smov %s1544_s15 }
 0x119   :  { %12 = sbr.rel (!%p10_p5) target bundleno = 2 (0x2), region = 76 }

// kernel: _aspp_forward.6
= control target key start
LH: loop header
LB: loop body
LE: loop exit
PB: predicated region body
PF: predicated region fallthrough
CT: control target
= control target key end

     0   :  { %s1198_s12 = smov 0   ;;  %s1200_s13 = smov 0   ;;  %s1487_s0 = inlined_call_operand.vmem [shape: f32[512,4], index: 0, kind: input, shape index: {}]   ;;  %s1488_s1 = inlined_call_operand.vmem [shape: f32[4,8], index: 1, kind: input, shape index: {}]   ;;  %s1489_s2 = inlined_call_operand.vmem [shape: f32[1,8], index: 2, kind: input, shape index: {}]   ;;  %s1490_s3 = inlined_call_operand.vmem [shape: f32[512,8], index: 3, kind: output, shape index: {}]  }
   0x1   :  { %s1202_s14 = smov 0  }
   0x2 LB: > { %s32_s15 = sadd.s32 1, %s1171_s13  ;;  %p1002_p0 = scmp.ge.s32.totalorder %s1175_s14, 1  ;;  %s1175_s14 = sphi %s1202_s14, %s13_s14   ;;  %s1171_s13 = sphi %s1200_s13, %s1493_s13   ;;  %s1167_s12 = sphi %s1198_s12, %s1492_s12  }
   0x3   : > { %p34_p1 = scmp.ge.s32.totalorder %s32_s15, 2  ;;  %p186_p2 = scmp.lt.s32.totalorder %s1175_s14, 3 }
   0x5   : > { %s1495_s15 = smov (%p34_p1, %s32_s15), 0  ;;  %p187_p3 = pnand %p1002_p0, %p186_p2 }
   0x6   : > { %v355_v0 = vld [vmem:[%s1488_s1] sm:$0xf] (!%p187_p3)  ;;  %vm453_vm0 = vcmask (!%p187_p3), 1043456   ;;  %s1003_s18 = sshll.u32 (!%p187_p3), %s1167_s12, 5  ;;  %vm258_vm1 = vcmask (!%p187_p3), 64512   ;;  %v1177_v1 = vmov (!%p187_p3), 0.0  }
   0x7   : > { %190 = sbr.rel (%p187_p3) target bundleno = 277 (0x115), region = 32  ;;  %1076 = vmatprep.subr.msk.mxu0 (!%p187_p3), %vm453_vm0, %v355_v0  ;;  %1126 = vmatprep.subr.msk.mxu1 (!%p187_p3), %vm453_vm0, %v355_v0  ;;  %p1224_p4 = scmp.lt.s32.totalorder (!%p187_p3), %s1003_s18, 63  ;;  %260 = vst.msk [vmem:[#allocation2 + $0x8] sm:$0xff] (!%p187_p3), %vm258_vm1, %v1177_v1  ;;  %259 = vst.msk [vmem:[#allocation2] sm:$0xff] (!%p187_p3), %vm258_vm1, %v1177_v1  ;;  %vm356_vm2 = vcmask (!%p187_p3), 31744  }
   0x8   : > { %1077 = vmatpush3.msk.msra.mxu0 (!%p187_p3), %vm453_vm0, %v355_v0  ;;  %1127 = vmatpush3.msk.msra.mxu1 (!%p187_p3), %vm453_vm0, %v355_v0  ;;  %261 = vst.msk [vmem:[#allocation2 + $0x10] sm:$0xff] (!%p187_p3), %vm258_vm1, %v1177_v1  ;;  %262 = vst.msk [vmem:[#allocation2 + $0x18] sm:$0xff] (!%p187_p3), %vm258_vm1, %v1177_v1  ;;  %v1347_v62 = vld [vmem:[%s1489_s2] ss:$0 sm:$0xff] (!%p187_p3) }
   0x9   : > { %263 = vst.msk [vmem:[#allocation2 + $0x20] sm:$0xff] (!%p187_p3), %vm258_vm1, %v1177_v1  ;;  %264 = vst.msk [vmem:[#allocation2 + $0x28] sm:$0xff] (!%p187_p3), %vm258_vm1, %v1177_v1 }
   0xa   : > { %265 = vst.msk [vmem:[#allocation2 + $0x30] sm:$0xff] (!%p187_p3), %vm258_vm1, %v1177_v1  ;;  %266 = vst.msk [vmem:[#allocation2 + $0x38] sm:$0xff] (!%p187_p3), %vm258_vm1, %v1177_v1 }
   0xb   : > { %267 = vst.msk [vmem:[#allocation2 + $0x40] sm:$0xff] (!%p187_p3), %vm258_vm1, %v1177_v1  ;;  %268 = vst.msk [vmem:[#allocation2 + $0x48] sm:$0xff] (!%p187_p3), %vm258_vm1, %v1177_v1 }
   0xc   : > { %269 = vst.msk [vmem:[#allocation2 + $0x50] sm:$0xff] (!%p187_p3), %vm258_vm1, %v1177_v1  ;;  %270 = vst.msk [vmem:[#allocation2 + $0x58] sm:$0xff] (!%p187_p3), %vm258_vm1, %v1177_v1 }
   0xd   : > { %271 = vst.msk [vmem:[#allocation2 + $0x60] sm:$0xff] (!%p187_p3), %vm258_vm1, %v1177_v1  ;;  %272 = vst.msk [vmem:[#allocation2 + $0x68] sm:$0xff] (!%p187_p3), %vm258_vm1, %v1177_v1 }
   0xe   : > { %273 = vst.msk [vmem:[#allocation2 + $0x70] sm:$0xff] %vm258_vm1, %v1177_v1  ;;  %274 = vst.msk [vmem:[#allocation2 + $0x78] sm:$0xff] %vm258_vm1, %v1177_v1  ;;  %s1497_s18 = smov (!%p1224_p4, %s1003_s18), 63  ;;  %v292_v34 = vld [vmem:[#allocation2 + $0x8] sm:$0xff]  ;;  %v291_v36 = vld [vmem:[#allocation2] sm:$0xff] }
   0xf   : > { %275 = vst.msk [vmem:[#allocation2 + $0x80] sm:$0xff] %vm258_vm1, %v1177_v1  ;;  %276 = vst.msk [vmem:[#allocation2 + $0x88] sm:$0xff] %vm258_vm1, %v1177_v1  ;;  %s1004_s20 = sshll.u32 %s1497_s18, 3  ;;  %v294_v46 = vld [vmem:[#allocation2 + $0x18] sm:$0xff]  ;;  %v293_v48 = vld [vmem:[#allocation2 + $0x10] sm:$0xff] }
  0x10   : > { %277 = vst.msk [vmem:[#allocation2 + $0x90] sm:$0xff] %vm258_vm1, %v1177_v1  ;;  %278 = vst.msk [vmem:[#allocation2 + $0x98] sm:$0xff] %vm258_vm1, %v1177_v1  ;;  %s1272_s23 = scalar_lea.vmem %s1487_s0, %s1004_s20  ;;  %v296_v58 = vld [vmem:[#allocation2 + $0x28] sm:$0xff]  ;;  %v295_v60 = vld [vmem:[#allocation2 + $0x20] sm:$0xff]  ;;  %s1360_s28 = scalar_lea.vmem %s1490_s3, %s1004_s20 }
  0x11   : > { %279 = vst.msk [vmem:[#allocation2 + $0xa0] sm:$0xff] %vm258_vm1, %v1177_v1  ;;  %280 = vst.msk [vmem:[#allocation2 + $0xa8] sm:$0xff] %vm258_vm1, %v1177_v1  ;;  %v323_v2 = vld [vmem:[%s1272_s23] sm:$0xff]  ;;  %v324_v4 = vld [vmem:[%s1272_s23 + $0x8] sm:$0xff] }
  0x12   : > { %281 = vst.msk [vmem:[#allocation2 + $0xb0] sm:$0xff] %vm258_vm1, %v1177_v1  ;;  %282 = vst.msk [vmem:[#allocation2 + $0xb8] sm:$0xff] %vm258_vm1, %v1177_v1  ;;  %v339_v3 = vld [vmem:[%s1272_s23 + $0x80] sm:$0xff]  ;;  %1078 = vmatprep.mubr.msk.f32.mxu0 %vm356_vm2, %v323_v2  ;;  %v340_v5 = vld [vmem:[%s1272_s23 + $0x88] sm:$0xff] }
  0x13   : > { %283 = vst.msk [vmem:[#allocation2 + $0xc0] sm:$0xff] %vm258_vm1, %v1177_v1  ;;  %284 = vst.msk [vmem:[#allocation2 + $0xc8] sm:$0xff] %vm258_vm1, %v1177_v1  ;;  %1102 = vmatprep.mubr.msk.f32.mxu1 %vm356_vm2, %v339_v3  ;;  %v325_v6 = vld [vmem:[%s1272_s23 + $0x10] sm:$0xff]  ;;  %1079 = vmatmul.mubr.msk.f32.vlgmr.msra.gmra.mrb[0].mxu0 %vm356_vm2, %v324_v4  ;;  %v326_v8 = vld [vmem:[%s1272_s23 + $0x18] sm:$0xff] }
  0x14   : > { %285 = vst.msk [vmem:[#allocation2 + $0xd0] sm:$0xff] %vm258_vm1, %v1177_v1  ;;  %286 = vst.msk [vmem:[#allocation2 + $0xd8] sm:$0xff] %vm258_vm1, %v1177_v1  ;;  %v341_v7 = vld [vmem:[%s1272_s23 + $0x90] sm:$0xff]  ;;  %1103 = vmatmul.mubr.msk.f32.vlgmr.msra.gmra.mrb[0].mxu1 %vm356_vm2, %v340_v5  ;;  %1081 = vmatprep.mubr.msk.f32.mxu0 %vm356_vm2, %v325_v6  ;;  %v342_v9 = vld [vmem:[%s1272_s23 + $0x98] sm:$0xff] }
  0x15   : > { %287 = vst.msk [vmem:[#allocation2 + $0xe0] sm:$0xff] %vm258_vm1, %v1177_v1  ;;  %288 = vst.msk [vmem:[#allocation2 + $0xe8] sm:$0xff] %vm258_vm1, %v1177_v1  ;;  %1105 = vmatprep.mubr.msk.f32.mxu1 %vm356_vm2, %v341_v7  ;;  %v327_v10 = vld [vmem:[%s1272_s23 + $0x20] sm:$0xff]  ;;  %v328_v12 = vld [vmem:[%s1272_s23 + $0x28] sm:$0xff] }
  0x16   : > { %289 = vst.msk [vmem:[#allocation2 + $0xf0] sm:$0xff] %vm258_vm1, %v1177_v1  ;;  %290 = vst.msk [vmem:[#allocation2 + $0xf8] sm:$0xff] %vm258_vm1, %v1177_v1  ;;  %v343_v11 = vld [vmem:[%s1272_s23 + $0xa0] sm:$0xff]  ;;  %v344_v13 = vld [vmem:[%s1272_s23 + $0xa8] sm:$0xff] }
  0x17   : > { %1082 = vmatmul.mubr.msk.f32.gmra.mrb[2].mxu0 %vm356_vm2, %v326_v8  ;;  %v329_v14 = vld [vmem:[%s1272_s23 + $0x30] sm:$0xff]  ;;  %v330_v16 = vld [vmem:[%s1272_s23 + $0x38] sm:$0xff]  ;;  %v331_v18 = vld [vmem:[%s1272_s23 + $0x40] sm:$0xff] }
  0x18   : > { %1106 = vmatmul.mubr.msk.f32.gmra.mrb[2].mxu1 %vm356_vm2, %v342_v9  ;;  %1084 = vmatprep.mubr.msk.f32.mxu0 %vm356_vm2, %v327_v10  ;;  %v345_v15 = vld [vmem:[%s1272_s23 + $0xb0] sm:$0xff]  ;;  %v346_v17 = vld [vmem:[%s1272_s23 + $0xb8] sm:$0xff]  ;;  %v347_v19 = vld [vmem:[%s1272_s23 + $0xc0] sm:$0xff] }
  0x19   : > { %1108 = vmatprep.mubr.msk.f32.mxu1 %vm356_vm2, %v343_v11  ;;  %v332_v20 = vld [vmem:[%s1272_s23 + $0x48] sm:$0xff]  ;;  %v333_v22 = vld [vmem:[%s1272_s23 + $0x50] sm:$0xff]  ;;  %v334_v24 = vld [vmem:[%s1272_s23 + $0x58] sm:$0xff] }
  0x1a   : > { %v348_v21 = vld [vmem:[%s1272_s23 + $0xc8] sm:$0xff]  ;;  %v349_v23 = vld [vmem:[%s1272_s23 + $0xd0] sm:$0xff]  ;;  %v350_v25 = vld [vmem:[%s1272_s23 + $0xd8] sm:$0xff] }
  0x1b   : > { %1085 = vmatmul.mubr.msk.f32.gmra.mrb[4].mxu0 %vm356_vm2, %v328_v12  ;;  %v335_v26 = vld [vmem:[%s1272_s23 + $0x60] sm:$0xff]  ;;  %v336_v28 = vld [vmem:[%s1272_s23 + $0x68] sm:$0xff]  ;;  %v337_v30 = vld [vmem:[%s1272_s23 + $0x70] sm:$0xff] }
  0x1c   : > { %1109 = vmatmul.mubr.msk.f32.gmra.mrb[4].mxu1 %vm356_vm2, %v344_v13  ;;  %1087 = vmatprep.mubr.msk.f32.mxu0 %vm356_vm2, %v329_v14  ;;  %v351_v27 = vld [vmem:[%s1272_s23 + $0xe0] sm:$0xff]  ;;  %v352_v29 = vld [vmem:[%s1272_s23 + $0xe8] sm:$0xff]  ;;  %v353_v31 = vld [vmem:[%s1272_s23 + $0xf0] sm:$0xff] }
  0x1d   : > { %1111 = vmatprep.mubr.msk.f32.mxu1 %vm356_vm2, %v345_v15  ;;  %v338_v32 = vld [vmem:[%s1272_s23 + $0x78] sm:$0xff]  ;;  %v308_v35 = vld [vmem:[#allocation2 + $0x88] sm:$0xff]  ;;  %v307_v37 = vld [vmem:[#allocation2 + $0x80] sm:$0xff] }
  0x1e   : > { %v354_v33 = vld [vmem:[%s1272_s23 + $0xf8] sm:$0xff]  ;;  %v309_v49 = vld [vmem:[#allocation2 + $0x90] sm:$0xff]  ;;  %v312_v59 = vld [vmem:[#allocation2 + $0xa8] sm:$0xff] }
  0x1f   : > { %1088 = vmatmul.mubr.msk.f32.gmra.mrb[6].mxu0 %vm356_vm2, %v330_v16  ;;  %v310_v47 = vld [vmem:[#allocation2 + $0x98] sm:$0xff]  ;;  %v311_v61 = vld [vmem:[#allocation2 + $0xa0] sm:$0xff]  ;;  %v297_v11 = vld [vmem:[#allocation2 + $0x30] sm:$0xff] }
  0x20   : > { %1112 = vmatmul.mubr.msk.f32.gmra.mrb[6].mxu1 %vm356_vm2, %v346_v17  ;;  %1090 = vmatprep.mubr.msk.f32.mxu0 %vm356_vm2, %v331_v18  ;;  %v298_v5 = vld [vmem:[#allocation2 + $0x38] sm:$0xff]  ;;  %v313_v16 = vld [vmem:[#allocation2 + $0xb0] sm:$0xff] }
  0x21   : > { %1114 = vmatprep.mubr.msk.f32.mxu1 %vm356_vm2, %v347_v19  ;;  %v314_v6 = vld [vmem:[#allocation2 + $0xb8] sm:$0xff] }
  0x23   : > { %1091 = vmatmul.mubr.msk.f32.gmra.mrb[8].mxu0 %vm356_vm2, %v332_v20 }
  0x24   : > { %1115 = vmatmul.mubr.msk.f32.gmra.mrb[8].mxu1 %vm356_vm2, %v348_v21  ;;  %1093 = vmatprep.mubr.msk.f32.mxu0 %vm356_vm2, %v333_v22 }
  0x25   : > { %1117 = vmatprep.mubr.msk.f32.mxu1 %vm356_vm2, %v349_v23 }
  0x27   : > { %1094 = vmatmul.mubr.msk.f32.gmra.mrb[10].mxu0 %vm356_vm2, %v334_v24 }
  0x28   : > { %1118 = vmatmul.mubr.msk.f32.gmra.mrb[10].mxu1 %vm356_vm2, %v350_v25  ;;  %1096 = vmatprep.mubr.msk.f32.mxu0 %vm356_vm2, %v335_v26 }
  0x29   : > { %1120 = vmatprep.mubr.msk.f32.mxu1 %vm356_vm2, %v351_v27  ;;  %v300_v27 = vld [vmem:[#allocation2 + $0x48] sm:$0xff] }
  0x2b   : > { %1097 = vmatmul.mubr.msk.f32.gmra.mrb[12].mxu0 %vm356_vm2, %v336_v28  ;;  %v316_v28 = vld [vmem:[#allocation2 + $0xc8] sm:$0xff] }
  0x2c   : > { %1121 = vmatmul.mubr.msk.f32.gmra.mrb[12].mxu1 %vm356_vm2, %v352_v29  ;;  %1099 = vmatprep.mubr.msk.f32.mxu0 %vm356_vm2, %v337_v30 }
  0x2d   : > { %1123 = vmatprep.mubr.msk.f32.mxu1 %vm356_vm2, %v353_v31 }
  0x2f   : > { %1100 = vmatmul.mubr.msk.f32.gmra.mrb[14].mxu0 %vm356_vm2, %v338_v32 }
  0x30   : > { %1124 = vmatmul.mubr.msk.f32.gmra.mrb[14].mxu1 %vm356_vm2, %v354_v33 }
  0xe6   : > { %v1080_v38 = vpop.f32.mrb[0].mxu0 }
  0xe7   : > { %v1104_v39 = vpop.f32.mrb[0].mxu1  ;;  %v683_v40 = vadd.f32 %v1080_v38, %v292_v34  ;;  %v523_v42 = vpop.f32.mrb[1].mxu0 }
  0xe8   : > { %v699_v41 = vadd.f32 %v1104_v39, %v308_v35  ;;  %v603_v43 = vpop.f32.mrb[1].mxu1  ;;  %v682_v44 = vadd.f32 %v523_v42, %v291_v36  ;;  %v299_v35 = vld [vmem:[#allocation2 + $0x40] sm:$0xff] }
  0xe9   : > { %v698_v45 = vadd.f32 %v603_v43, %v307_v37  ;;  %716 = vst.msk [vmem:[#allocation2 + $0x8] sm:$0xff] %vm258_vm1, %v683_v40  ;;  %v315_v40 = vld [vmem:[#allocation2 + $0xc0] sm:$0xff] }
  0xea   : > { %732 = vst.msk [vmem:[#allocation2 + $0x88] sm:$0xff] %vm258_vm1, %v699_v41  ;;  %715 = vst.msk [vmem:[#allocation2] sm:$0xff] %vm258_vm1, %v682_v44  ;;  %v1083_v50 = vpop.f32.mrb[2].mxu0 }
  0xeb   : > { %731 = vst.msk [vmem:[#allocation2 + $0x80] sm:$0xff] %vm258_vm1, %v698_v45  ;;  %v1107_v51 = vpop.f32.mrb[2].mxu1  ;;  %v685_v52 = vadd.f32 %v1083_v50, %v294_v46  ;;  %v533_v54 = vpop.f32.mrb[3].mxu0 }
  0xec   : > { %v701_v53 = vadd.f32 %v1107_v51, %v310_v47  ;;  %v613_v55 = vpop.f32.mrb[3].mxu1  ;;  %v684_v56 = vadd.f32 %v533_v54, %v293_v48  ;;  %v302_v51 = vld [vmem:[#allocation2 + $0x58] sm:$0xff] }
  0xed   : > { %v700_v57 = vadd.f32 %v613_v55, %v309_v49  ;;  %718 = vst.msk [vmem:[#allocation2 + $0x18] sm:$0xff] %vm258_vm1, %v685_v52  ;;  %v318_v52 = vld [vmem:[#allocation2 + $0xd8] sm:$0xff] }
  0xee   : > { %734 = vst.msk [vmem:[#allocation2 + $0x98] sm:$0xff] %vm258_vm1, %v701_v53  ;;  %717 = vst.msk [vmem:[#allocation2 + $0x10] sm:$0xff] %vm258_vm1, %v684_v56  ;;  %v1086_v63 = vpop.f32.mrb[4].mxu0 }
  0xef   : > { %733 = vst.msk [vmem:[#allocation2 + $0x90] sm:$0xff] %vm258_vm1, %v700_v57  ;;  %v1110_v0 = vpop.f32.mrb[4].mxu1  ;;  %v687_v1 = vadd.f32 %v1086_v63, %v296_v58  ;;  %v543_v3 = vpop.f32.mrb[5].mxu0 }
  0xf0   : > { %v703_v2 = vadd.f32 %v1110_v0, %v312_v59  ;;  %v623_v4 = vpop.f32.mrb[5].mxu1  ;;  %v751_v7 = vld [vmem:[#allocation2 + $0x8] sm:$0xff]  ;;  %v686_v9 = vadd.f32 %v543_v3, %v295_v60  ;;  %v301_v59 = vld [vmem:[#allocation2 + $0x50] sm:$0xff] }
  0xf1   : > { %v767_v8 = vld [vmem:[#allocation2 + $0x88] sm:$0xff]  ;;  %v702_v10 = vadd.f32 %v623_v4, %v311_v61  ;;  %v790_v12 = vadd.f32 %v1347_v62, %v751_v7  ;;  %v750_v14 = vld [vmem:[#allocation2] sm:$0xff]  ;;  %720 = vst.msk [vmem:[#allocation2 + $0x28] sm:$0xff] %vm258_vm1, %v687_v1  ;;  %v317_v1 = vld [vmem:[#allocation2 + $0xd0] sm:$0xff] }
  0xf2   : > { %v806_v13 = vadd.f32 %v1347_v62, %v767_v8  ;;  %v766_v15 = vld [vmem:[#allocation2 + $0x80] sm:$0xff]  ;;  %736 = vst.msk [vmem:[#allocation2 + $0xa8] sm:$0xff] %vm258_vm1, %v703_v2  ;;  %v789_v17 = vadd.f32 %v1347_v62, %v750_v14  ;;  %719 = vst.msk [vmem:[#allocation2 + $0x20] sm:$0xff] %vm258_vm1, %v686_v9  ;;  %v1089_v19 = vpop.f32.mrb[6].mxu0 }
  0xf3   : > { %v805_v18 = vadd.f32 %v1347_v62, %v766_v15  ;;  %735 = vst.msk [vmem:[#allocation2 + $0xa0] sm:$0xff] %vm258_vm1, %v702_v10  ;;  %v1113_v20 = vpop.f32.mrb[6].mxu1  ;;  %v822_v21 = vmax.f32 %v790_v12, 0.0  ;;  %v689_v23 = vadd.f32 %v1089_v19, %v298_v5  ;;  %v553_v25 = vpop.f32.mrb[7].mxu0  ;;  %v304_v12 = vld [vmem:[#allocation2 + $0x68] sm:$0xff] }
  0xf4   : > { %v838_v22 = vmax.f32 %v806_v13, 0.0  ;;  %v705_v24 = vadd.f32 %v1113_v20, %v314_v6  ;;  %v633_v26 = vpop.f32.mrb[7].mxu1  ;;  %v821_v29 = vmax.f32 %v789_v17, 0.0  ;;  %v753_v31 = vld [vmem:[#allocation2 + $0x18] sm:$0xff]  ;;  %v688_v33 = vadd.f32 %v553_v25, %v297_v11  ;;  %v320_v13 = vld [vmem:[#allocation2 + $0xe8] sm:$0xff]  ;;  %v303_v20 = vld [vmem:[#allocation2 + $0x60] sm:$0xff] }
  0xf5   : > { %v837_v30 = vmax.f32 %v805_v18, 0.0  ;;  %v769_v32 = vld [vmem:[#allocation2 + $0x98] sm:$0xff]  ;;  %v704_v34 = vadd.f32 %v633_v26, %v313_v16  ;;  %854 = vst.msk [vmem:[%s1360_s28 + $0x8] sm:$0xff] %vm258_vm1, %v822_v21  ;;  %v792_v36 = vadd.f32 %v1347_v62, %v753_v31  ;;  %v752_v38 = vld [vmem:[#allocation2 + $0x10] sm:$0xff]  ;;  %722 = vst.msk [vmem:[#allocation2 + $0x38] sm:$0xff] %vm258_vm1, %v689_v23 }
  0xf6   : > { %870 = vst.msk [vmem:[%s1360_s28 + $0x88] sm:$0xff] %vm258_vm1, %v838_v22  ;;  %v808_v37 = vadd.f32 %v1347_v62, %v769_v32  ;;  %v768_v39 = vld [vmem:[#allocation2 + $0x90] sm:$0xff]  ;;  %738 = vst.msk [vmem:[#allocation2 + $0xb8] sm:$0xff] %vm258_vm1, %v705_v24  ;;  %v791_v41 = vadd.f32 %v1347_v62, %v752_v38  ;;  %v1092_v43 = vpop.f32.mrb[8].mxu0  ;;  %v319_v25 = vld [vmem:[#allocation2 + $0xe0] sm:$0xff] }
  0xf7   : > { %853 = vst.msk [vmem:[%s1360_s28] sm:$0xff] %vm258_vm1, %v821_v29  ;;  %869 = vst.msk [vmem:[%s1360_s28 + $0x80] sm:$0xff] %vm258_vm1, %v837_v30  ;;  %v807_v42 = vadd.f32 %v1347_v62, %v768_v39  ;;  %v1116_v44 = vpop.f32.mrb[8].mxu1  ;;  %v824_v45 = vmax.f32 %v792_v36, 0.0  ;;  %v691_v47 = vadd.f32 %v1092_v43, %v300_v27  ;;  %v563_v49 = vpop.f32.mrb[9].mxu0  ;;  %v306_v36 = vld [vmem:[#allocation2 + $0x78] sm:$0xff] }
  0xf8   : > { %721 = vst.msk [vmem:[#allocation2 + $0x30] sm:$0xff] %vm258_vm1, %v688_v33  ;;  %737 = vst.msk [vmem:[#allocation2 + $0xb0] sm:$0xff] %vm258_vm1, %v704_v34  ;;  %v840_v46 = vmax.f32 %v808_v37, 0.0  ;;  %v707_v48 = vadd.f32 %v1116_v44, %v316_v28  ;;  %v643_v50 = vpop.f32.mrb[9].mxu1  ;;  %v823_v53 = vmax.f32 %v791_v41, 0.0  ;;  %v755_v55 = vld [vmem:[#allocation2 + $0x28] sm:$0xff]  ;;  %v690_v57 = vadd.f32 %v563_v49, %v299_v35 }
  0xf9   : > { %v839_v54 = vmax.f32 %v807_v42, 0.0  ;;  %v771_v56 = vld [vmem:[#allocation2 + $0xa8] sm:$0xff]  ;;  %v706_v58 = vadd.f32 %v643_v50, %v315_v40  ;;  %856 = vst.msk [vmem:[%s1360_s28 + $0x18] sm:$0xff] %vm258_vm1, %v824_v45  ;;  %v794_v60 = vadd.f32 %v1347_v62, %v755_v55  ;;  %v754_v63 = vld [vmem:[#allocation2 + $0x20] sm:$0xff]  ;;  %724 = vst.msk [vmem:[#allocation2 + $0x48] sm:$0xff] %vm258_vm1, %v691_v47 }
  0xfa   : > { %872 = vst.msk [vmem:[%s1360_s28 + $0x98] sm:$0xff] %vm258_vm1, %v840_v46  ;;  %v810_v61 = vadd.f32 %v1347_v62, %v771_v56  ;;  %v770_v0 = vld [vmem:[#allocation2 + $0xa0] sm:$0xff]  ;;  %740 = vst.msk [vmem:[#allocation2 + $0xc8] sm:$0xff] %vm258_vm1, %v707_v48  ;;  %v793_v2 = vadd.f32 %v1347_v62, %v754_v63  ;;  %v1095_v4 = vpop.f32.mrb[10].mxu0  ;;  %v322_v37 = vld [vmem:[#allocation2 + $0xf8] sm:$0xff] }
  0xfb   : > { %855 = vst.msk [vmem:[%s1360_s28 + $0x10] sm:$0xff] %vm258_vm1, %v823_v53  ;;  %871 = vst.msk [vmem:[%s1360_s28 + $0x90] sm:$0xff] %vm258_vm1, %v839_v54  ;;  %v809_v3 = vadd.f32 %v1347_v62, %v770_v0  ;;  %v1119_v5 = vpop.f32.mrb[10].mxu1  ;;  %v826_v6 = vmax.f32 %v794_v60, 0.0  ;;  %v693_v8 = vadd.f32 %v1095_v4, %v302_v51  ;;  %v573_v10 = vpop.f32.mrb[11].mxu0  ;;  %v305_v44 = vld [vmem:[#allocation2 + $0x70] sm:$0xff] }
  0xfc   : > { %723 = vst.msk [vmem:[#allocation2 + $0x40] sm:$0xff] %vm258_vm1, %v690_v57  ;;  %739 = vst.msk [vmem:[#allocation2 + $0xc0] sm:$0xff] %vm258_vm1, %v706_v58  ;;  %v842_v7 = vmax.f32 %v810_v61, 0.0  ;;  %v709_v9 = vadd.f32 %v1119_v5, %v318_v52  ;;  %v653_v11 = vpop.f32.mrb[11].mxu1  ;;  %v825_v14 = vmax.f32 %v793_v2, 0.0  ;;  %v757_v16 = vld [vmem:[#allocation2 + $0x38] sm:$0xff]  ;;  %v692_v18 = vadd.f32 %v573_v10, %v301_v59 }
  0xfd   : > { %v841_v15 = vmax.f32 %v809_v3, 0.0  ;;  %v773_v17 = vld [vmem:[#allocation2 + $0xb8] sm:$0xff]  ;;  %v708_v19 = vadd.f32 %v653_v11, %v317_v1  ;;  %858 = vst.msk [vmem:[%s1360_s28 + $0x28] sm:$0xff] %vm258_vm1, %v826_v6  ;;  %v796_v21 = vadd.f32 %v1347_v62, %v757_v16  ;;  %726 = vst.msk [vmem:[#allocation2 + $0x58] sm:$0xff] %vm258_vm1, %v693_v8  ;;  %v321_v49 = vld [vmem:[#allocation2 + $0xf0] sm:$0xff] }
  0xfe   : > { %874 = vst.msk [vmem:[%s1360_s28 + $0xa8] sm:$0xff] %vm258_vm1, %v842_v7  ;;  %v812_v22 = vadd.f32 %v1347_v62, %v773_v17  ;;  %742 = vst.msk [vmem:[#allocation2 + $0xd8] sm:$0xff] %vm258_vm1, %v709_v9  ;;  %v1098_v28 = vpop.f32.mrb[12].mxu0 }
  0xff   : > { %v756_v23 = vld [vmem:[#allocation2 + $0x30] sm:$0xff]  ;;  %857 = vst.msk [vmem:[%s1360_s28 + $0x20] sm:$0xff] %vm258_vm1, %v825_v14  ;;  %873 = vst.msk [vmem:[%s1360_s28 + $0xa0] sm:$0xff] %vm258_vm1, %v841_v15  ;;  %v1122_v29 = vpop.f32.mrb[12].mxu1  ;;  %v828_v30 = vmax.f32 %v796_v21, 0.0  ;;  %v695_v32 = vadd.f32 %v1098_v28, %v304_v12  ;;  %v583_v34 = vpop.f32.mrb[13].mxu0 }
 0x100   : > { %v772_v24 = vld [vmem:[#allocation2 + $0xb0] sm:$0xff]  ;;  %v795_v26 = vadd.f32 %v1347_v62, %v756_v23  ;;  %725 = vst.msk [vmem:[#allocation2 + $0x50] sm:$0xff] %vm258_vm1, %v692_v18  ;;  %741 = vst.msk [vmem:[#allocation2 + $0xd0] sm:$0xff] %vm258_vm1, %v708_v19  ;;  %v844_v31 = vmax.f32 %v812_v22, 0.0  ;;  %v711_v33 = vadd.f32 %v1122_v29, %v320_v13  ;;  %v663_v35 = vpop.f32.mrb[13].mxu1  ;;  %v759_v40 = vld [vmem:[#allocation2 + $0x48] sm:$0xff]  ;;  %v694_v42 = vadd.f32 %v583_v34, %v303_v20 }
 0x101   : > { %v811_v27 = vadd.f32 %v1347_v62, %v772_v24  ;;  %v775_v41 = vld [vmem:[#allocation2 + $0xc8] sm:$0xff]  ;;  %v710_v43 = vadd.f32 %v663_v35, %v319_v25  ;;  %860 = vst.msk [vmem:[%s1360_s28 + $0x38] sm:$0xff] %vm258_vm1, %v828_v30  ;;  %v798_v45 = vadd.f32 %v1347_v62, %v759_v40  ;;  %728 = vst.msk [vmem:[#allocation2 + $0x68] sm:$0xff] %vm258_vm1, %v695_v32 }
 0x102   : > { %v827_v38 = vmax.f32 %v795_v26, 0.0  ;;  %876 = vst.msk [vmem:[%s1360_s28 + $0xb8] sm:$0xff] %vm258_vm1, %v844_v31  ;;  %v814_v46 = vadd.f32 %v1347_v62, %v775_v41  ;;  %744 = vst.msk [vmem:[#allocation2 + $0xe8] sm:$0xff] %vm258_vm1, %v711_v33  ;;  %v1101_v52 = vpop.f32.mrb[14].mxu0 }
 0x103   : > { %v843_v39 = vmax.f32 %v811_v27, 0.0  ;;  %v758_v47 = vld [vmem:[#allocation2 + $0x40] sm:$0xff]  ;;  %727 = vst.msk [vmem:[#allocation2 + $0x60] sm:$0xff] %vm258_vm1, %v694_v42  ;;  %743 = vst.msk [vmem:[#allocation2 + $0xe0] sm:$0xff] %vm258_vm1, %v710_v43  ;;  %v1125_v53 = vpop.f32.mrb[14].mxu1  ;;  %v830_v54 = vmax.f32 %v798_v45, 0.0  ;;  %v697_v56 = vadd.f32 %v1101_v52, %v306_v36 }
 0x104   : > { %v774_v48 = vld [vmem:[#allocation2 + $0xc0] sm:$0xff]  ;;  %859 = vst.msk [vmem:[%s1360_s28 + $0x30] sm:$0xff] %vm258_vm1, %v827_v38  ;;  %v797_v50 = vadd.f32 %v1347_v62, %v758_v47  ;;  %v846_v55 = vmax.f32 %v814_v46, 0.0  ;;  %v713_v57 = vadd.f32 %v1125_v53, %v322_v37  ;;  %v593_v58 = vpop.f32.mrb[15].mxu0  ;;  %v673_v59 = vpop.f32.mrb[15].mxu1  ;;  %v761_v63 = vld [vmem:[#allocation2 + $0x58] sm:$0xff] }
 0x105   : > { %875 = vst.msk [vmem:[%s1360_s28 + $0xb0] sm:$0xff] %vm258_vm1, %v843_v39  ;;  %v813_v51 = vadd.f32 %v1347_v62, %v774_v48  ;;  %v777_v0 = vld [vmem:[#allocation2 + $0xd8] sm:$0xff]  ;;  %v696_v1 = vadd.f32 %v593_v58, %v305_v44  ;;  %v712_v2 = vadd.f32 %v673_v59, %v321_v49  ;;  %862 = vst.msk [vmem:[%s1360_s28 + $0x48] sm:$0xff] %vm258_vm1, %v830_v54 }
 0x106   : > { %v829_v60 = vmax.f32 %v797_v50, 0.0  ;;  %878 = vst.msk [vmem:[%s1360_s28 + $0xc8] sm:$0xff] %vm258_vm1, %v846_v55  ;;  %v800_v3 = vadd.f32 %v1347_v62, %v761_v63  ;;  %v816_v4 = vadd.f32 %v1347_v62, %v777_v0  ;;  %730 = vst.msk [vmem:[#allocation2 + $0x78] sm:$0xff] %vm258_vm1, %v697_v56 }
 0x107   : > { %v845_v61 = vmax.f32 %v813_v51, 0.0  ;;  %v760_v5 = vld [vmem:[#allocation2 + $0x50] sm:$0xff]  ;;  %746 = vst.msk [vmem:[#allocation2 + $0xf8] sm:$0xff] %vm258_vm1, %v713_v57  ;;  %729 = vst.msk [vmem:[#allocation2 + $0x70] sm:$0xff] %vm258_vm1, %v696_v1 }
 0x108   : > { %v776_v6 = vld [vmem:[#allocation2 + $0xd0] sm:$0xff]  ;;  %861 = vst.msk [vmem:[%s1360_s28 + $0x40] sm:$0xff] %vm258_vm1, %v829_v60  ;;  %v799_v7 = vadd.f32 %v1347_v62, %v760_v5  ;;  %745 = vst.msk [vmem:[#allocation2 + $0xf0] sm:$0xff] %vm258_vm1, %v712_v2  ;;  %v832_v9 = vmax.f32 %v800_v3, 0.0  ;;  %v848_v10 = vmax.f32 %v816_v4, 0.0  ;;  %v763_v13 = vld [vmem:[#allocation2 + $0x68] sm:$0xff] }
 0x109   : > { %877 = vst.msk [vmem:[%s1360_s28 + $0xc0] sm:$0xff] %vm258_vm1, %v845_v61  ;;  %v815_v8 = vadd.f32 %v1347_v62, %v776_v6  ;;  %v779_v14 = vld [vmem:[#allocation2 + $0xe8] sm:$0xff]  ;;  %v802_v15 = vadd.f32 %v1347_v62, %v763_v13 }
 0x10a   : > { %v831_v11 = vmax.f32 %v799_v7, 0.0  ;;  %864 = vst.msk [vmem:[%s1360_s28 + $0x58] sm:$0xff] %vm258_vm1, %v832_v9  ;;  %880 = vst.msk [vmem:[%s1360_s28 + $0xd8] sm:$0xff] %vm258_vm1, %v848_v10  ;;  %v818_v16 = vadd.f32 %v1347_v62, %v779_v14  ;;  %v762_v17 = vld [vmem:[#allocation2 + $0x60] sm:$0xff] }
 0x10b   : > { %v847_v12 = vmax.f32 %v815_v8, 0.0  ;;  %v778_v18 = vld [vmem:[#allocation2 + $0xe0] sm:$0xff]  ;;  %v801_v19 = vadd.f32 %v1347_v62, %v762_v17  ;;  %v834_v21 = vmax.f32 %v802_v15, 0.0 }
 0x10c   : > { %863 = vst.msk [vmem:[%s1360_s28 + $0x50] sm:$0xff] %vm258_vm1, %v831_v11  ;;  %v817_v20 = vadd.f32 %v1347_v62, %v778_v18  ;;  %v850_v22 = vmax.f32 %v818_v16, 0.0 }
 0x10d   : > { %879 = vst.msk [vmem:[%s1360_s28 + $0xd0] sm:$0xff] %vm258_vm1, %v847_v12  ;;  %v833_v23 = vmax.f32 %v801_v19, 0.0  ;;  %v765_v25 = vld [vmem:[#allocation2 + $0x78] sm:$0xff]  ;;  %866 = vst.msk [vmem:[%s1360_s28 + $0x68] sm:$0xff] %vm258_vm1, %v834_v21 }
 0x10e   : > { %v849_v24 = vmax.f32 %v817_v20, 0.0  ;;  %v781_v26 = vld [vmem:[#allocation2 + $0xf8] sm:$0xff]  ;;  %882 = vst.msk [vmem:[%s1360_s28 + $0xe8] sm:$0xff] %vm258_vm1, %v850_v22  ;;  %v804_v27 = vadd.f32 %v1347_v62, %v765_v25  ;;  %v764_v29 = vld [vmem:[#allocation2 + $0x70] sm:$0xff] }
 0x10f   : > { %v820_v28 = vadd.f32 %v1347_v62, %v781_v26  ;;  %v780_v30 = vld [vmem:[#allocation2 + $0xf0] sm:$0xff]  ;;  %865 = vst.msk [vmem:[%s1360_s28 + $0x60] sm:$0xff] %vm258_vm1, %v833_v23  ;;  %v803_v31 = vadd.f32 %v1347_v62, %v764_v29 }
 0x110   : > { %881 = vst.msk [vmem:[%s1360_s28 + $0xe0] sm:$0xff] %vm258_vm1, %v849_v24  ;;  %v819_v32 = vadd.f32 %v1347_v62, %v780_v30  ;;  %v836_v33 = vmax.f32 %v804_v27, 0.0 }
 0x111   : > { %v852_v34 = vmax.f32 %v820_v28, 0.0  ;;  %v835_v35 = vmax.f32 %v803_v31, 0.0 }
 0x112   : > { %v851_v36 = vmax.f32 %v819_v32, 0.0  ;;  %868 = vst.msk [vmem:[%s1360_s28 + $0x78] sm:$0xff] %vm258_vm1, %v836_v33 }
 0x113   : > { %884 = vst.msk [vmem:[%s1360_s28 + $0xf8] sm:$0xff] %vm258_vm1, %v852_v34  ;;  %867 = vst.msk [vmem:[%s1360_s28 + $0x70] sm:$0xff] %vm258_vm1, %v835_v35 }
 0x114   : > { %883 = vst.msk [vmem:[%s1360_s28 + $0xf0] sm:$0xff] %vm258_vm1, %v851_v36 }
 0x115 PF: > { %s13_s14 = sadd.s32 1, %s1175_s14   ;;  %s1492_s12 = smov %s1171_s13 }
 0x116   : > { %p10_p5 = scmp.ge.s32.totalorder %s13_s14, 4   ;;  %s1493_s13 = smov %s1495_s15 }
 0x118   :  { %12 = sbr.rel (!%p10_p5) target bundleno = 2 (0x2), region = 76 }

// kernel: _aspp_forward.9
= control target key start
LH: loop header
LB: loop body
LE: loop exit
PB: predicated region body
PF: predicated region fallthrough
CT: control target
= control target key end

     0   :  { %vm12_vm0 = vcmask 7168   ;;  %v34_v2 = vmov 0.0   ;;  %s54_s0 = inlined_call_operand.vmem [shape: f32[8,256], index: 0, kind: input, shape index: {}]   ;;  %s55_s1 = inlined_call_operand.vmem [shape: f32[8,1], index: 1, kind: output, shape index: {}]  }
   0x1   :  { %v14_v0 = vld [vmem:[%s54_s0] sm:$0xff]  ;;  %v15_v1 = vld [vmem:[%s54_s0 + $0x8] sm:$0xff]  ;;  %13 = vst.msk [vmem:[#allocation2] sm:$0xff] %vm12_vm0, %v34_v2 }
   0x2   :  { %v17_v3 = vadd.f32 %v15_v1, %v14_v0 }
   0x4   :  { %18 = vadd.xlane.f32.xlu0 %v17_v3 }
   0x8   :  { %v16_v4 = vld [vmem:[#allocation2] sm:$0xff] }
  0x91   :  { %v19_v5 = vpop.xlane.xlu0 %18 }
  0x92   :  { %v20_v6 = vadd.f32 %v19_v5, %v16_v4 }
  0x94   :  { %22 = vst.msk [vmem:[#allocation2] sm:$0xff] %vm12_vm0, %v20_v6 }
  0x9b   :  { %v26_v7 = vld [vmem:[#allocation2] sm:$0xff] }
  0x9c   :  { %v27_v8 = vmul.f32 0.00390625, %v26_v7 }
  0x9e   :  { %28 = vst.msk [vmem:[%s55_s1] sm:$0xff] %vm12_vm0, %v27_v8 }

// kernel: _aspp_forward.10
= control target key start
LH: loop header
LB: loop body
LE: loop exit
PB: predicated region body
PF: predicated region fallthrough
CT: control target
= control target key end

     0   :  { %vm18_vm0 = vcmask 58368   ;;  %vm27_vm1 = vcmask 1043456   ;;  %v134_v0 = vmov 0.0   ;;  %vm135_vm2 = vmmov 0   ;;  %s171_s1 = inlined_call_operand.vmem [shape: f32[4,8], index: 1, kind: input, shape index: {}]   ;;  %s172_s0 = inlined_call_operand.vmem [shape: f32[2,4], index: 0, kind: input, shape index: {}]   ;;  %s173_s2 = inlined_call_operand.vmem [shape: f32[1,8], index: 2, kind: input, shape index: {}]   ;;  %s174_s3 = inlined_call_operand.vmem [shape: f32[2,8], index: 3, kind: output, shape index: {}]  }
   0x1   :  { %19 = vst.msk [vmem:[#allocation2] sm:$0x3] %vm18_vm0, %v134_v0  ;;  %127 = vmatprep.subr.mxu0 %v134_v0  ;;  %v22_v1 = vld [vmem:[%s171_s1] sm:$0xf]  ;;  %129 = vmatprep.mubr.msk.f32.mxu0 %vm135_vm2, %v134_v0  ;;  %vm23_vm3 = vcmask 31744  }
   0x2   :  { %v21_v2 = vld [vmem:[%s172_s0] sm:$0x3]  ;;  %128 = vmatpush3.msk.msra.mxu0 %vm27_vm1, %v22_v1 }
   0x3   :  { %130 = vmatmul.mubr.msk.f32.vlgmr.msra.gmra.mrb[0].mxu0 %vm23_vm3, %v21_v2  ;;  %v124_v7 = vld [vmem:[%s173_s2] ss:$0 sm:$0xff] }
   0x8   :  { %v20_v3 = vld [vmem:[#allocation2] sm:$0x3] }
  0xd6   :  { %v97_v4 = vpop.f32.mrb[0].mxu0 }
  0xd7   :  { %v101_v5 = vadd.f32 %v97_v4, %v20_v3  ;;  %v131_v6 = vpop.f32.mrb[1].mxu0 }
  0xd9   :  { %103 = vst.msk [vmem:[#allocation2] sm:$0x3] %vm18_vm0, %v101_v5 }
  0xe0   :  { %v107_v8 = vld [vmem:[#allocation2] sm:$0x3] }
  0xe1   :  { %v115_v9 = vadd.f32 %v124_v7, %v107_v8 }
  0xe3   :  { %v116_v10 = vmax.f32 %v115_v9, 0.0 }
  0xe5   :  { %117 = vst.msk [vmem:[%s174_s3] sm:$0x3] %vm18_vm0, %v116_v10 }

// kernel: _aspp_forward.11
= control target key start
LH: loop header
LB: loop body
LE: loop exit
PB: predicated region body
PF: predicated region fallthrough
CT: control target
= control target key end

     0   :  { %s1220_s12 = smov 0   ;;  %s1222_s13 = smov 0   ;;  %s1518_s0 = inlined_call_operand.vmem [shape: f32[512,32], index: 0, kind: input, shape index: {}]   ;;  %s1519_s1 = inlined_call_operand.vmem [shape: f32[32,8], index: 1, kind: input, shape index: {}]   ;;  %s1520_s2 = inlined_call_operand.vmem [shape: f32[1,8], index: 2, kind: input, shape index: {}]   ;;  %s1521_s3 = inlined_call_operand.vmem [shape: f32[512,8], index: 3, kind: output, shape index: {}]  }
   0x1   :  { %s1224_s14 = smov 0  }
   0x2 LB: > { %s32_s15 = sadd.s32 1, %s1193_s13  ;;  %p1006_p0 = scmp.ge.s32.totalorder %s1197_s14, 1  ;;  %s1197_s14 = sphi %s1224_s14, %s13_s14   ;;  %s1193_s13 = sphi %s1222_s13, %s1524_s13   ;;  %s1189_s12 = sphi %s1220_s12, %s1523_s12  }
   0x3   : > { %p34_p1 = scmp.ge.s32.totalorder %s32_s15, 2  ;;  %p188_p2 = scmp.lt.s32.totalorder %s1197_s14, 3 }
   0x5   : > { %s1526_s15 = smov (%p34_p1, %s32_s15), 0  ;;  %p189_p3 = pnand %p1006_p0, %p188_p2 }
   0x6   : > { %v360_v0 = vld [vmem:[%s1519_s1] sm:$0xff] (!%p189_p3)  ;;  %v361_v1 = vld [vmem:[%s1519_s1 + $0x8] sm:$0xff] (!%p189_p3)  ;;  %v362_v2 = vld [vmem:[%s1519_s1 + $0x10] sm:$0xff] (!%p189_p3)  ;;  %s1007_s22 = sshll.u32 (!%p189_p3), %s1189_s12, 5  ;;  %vm263_vm0 = vcmask (!%p189_p3), 64512   ;;  %v1199_v6 = vmov (!%p189_p3), 0.0  }
   0x7   : > { %192 = sbr.rel (%p189_p3) target bundleno = 277 (0x115), region = 32  ;;  %v1138_v3 = vpack.c.bf16 (!%p189_p3), %v361_v1, %v360_v0  ;;  %v363_v4 = vld [vmem:[%s1519_s1 + $0x18] sm:$0xff] (!%p189_p3)  ;;  %p1255_p4 = scmp.lt.s32.totalorder (!%p189_p3), %s1007_s22, 63  ;;  %265 = vst.msk [vmem:[#allocation2 + $0x8] sm:$0xff] (!%p189_p3), %vm263_vm0, %v1199_v6  ;;  %264 = vst.msk [vmem:[#allocation2] sm:$0xff] (!%p189_p3), %vm263_vm0, %v1199_v6  ;;  %vm364_vm1 = vcmask (!%p189_p3), 261120  }
   0x8   : > { %v1142_v5 = vpack.c.bf16 (!%p189_p3), %v363_v4, %v362_v2  ;;  %266 = vst.msk [vmem:[#allocation2 + $0x10] sm:$0xff] (!%p189_p3), %vm263_vm0, %v1199_v6  ;;  %267 = vst.msk [vmem:[#allocation2 + $0x18] sm:$0xff] (!%p189_p3), %vm263_vm0, %v1199_v6 }
   0x9   : > { %268 = vst.msk [vmem:[#allocation2 + $0x20] sm:$0xff] (!%p189_p3), %vm263_vm0, %v1199_v6  ;;  %269 = vst.msk [vmem:[#allocation2 + $0x28] sm:$0xff] (!%p189_p3), %vm263_vm0, %v1199_v6  ;;  %1139 = vmatprep.subr.bf16.mxu0 (!%p189_p3), %v1138_v3  ;;  %1146 = vmatprep.subr.bf16.mxu1 (!%p189_p3), %v1138_v3 }
   0xa   : > { %270 = vst.msk [vmem:[#allocation2 + $0x30] sm:$0xff] (!%p189_p3), %vm263_vm0, %v1199_v6  ;;  %271 = vst.msk [vmem:[#allocation2 + $0x38] sm:$0xff] (!%p189_p3), %vm263_vm0, %v1199_v6  ;;  %1141 = vmatpush3.bf16.msra.mxu0 (!%p189_p3), %v1138_v3  ;;  %1148 = vmatpush3.bf16.msra.mxu1 (!%p189_p3), %v1138_v3  ;;  %v1378_v3 = vld [vmem:[%s1520_s2] ss:$0 sm:$0xff] (!%p189_p3) }
   0xb   : > { %272 = vst.msk [vmem:[#allocation2 + $0x40] sm:$0xff] (!%p189_p3), %vm263_vm0, %v1199_v6  ;;  %273 = vst.msk [vmem:[#allocation2 + $0x48] sm:$0xff] (!%p189_p3), %vm263_vm0, %v1199_v6  ;;  %1143 = vmatprep.subr.bf16.mxu0 (!%p189_p3), %v1142_v5  ;;  %1147 = vmatprep.subr.bf16.mxu1 (!%p189_p3), %v1142_v5 }
   0xc   : > { %274 = vst.msk [vmem:[#allocation2 + $0x50] sm:$0xff] (!%p189_p3), %vm263_vm0, %v1199_v6  ;;  %275 = vst.msk [vmem:[#allocation2 + $0x58] sm:$0xff] (!%p189_p3), %vm263_vm0, %v1199_v6 }
   0xd   : > { %276 = vst.msk [vmem:[#allocation2 + $0x60] sm:$0xff] (!%p189_p3), %vm263_vm0, %v1199_v6  ;;  %277 = vst.msk [vmem:[#allocation2 + $0x68] sm:$0xff] (!%p189_p3), %vm263_vm0, %v1199_v6 }
   0xe   : > { %278 = vst.msk [vmem:[#allocation2 + $0x70] sm:$0xff] %vm263_vm0, %v1199_v6  ;;  %279 = vst.msk [vmem:[#allocation2 + $0x78] sm:$0xff] %vm263_vm0, %v1199_v6  ;;  %s1528_s22 = smov (!%p1255_p4, %s1007_s22), 63  ;;  %1145 = vmatpush3.bf16.msra.mxu0 %v1142_v5  ;;  %1149 = vmatpush3.bf16.msra.mxu1 %v1142_v5  ;;  %v297_v39 = vld [vmem:[#allocation2 + $0x8] sm:$0xff]  ;;  %v296_v41 = vld [vmem:[#allocation2] sm:$0xff] }
   0xf   : > { %280 = vst.msk [vmem:[#allocation2 + $0x80] sm:$0xff] %vm263_vm0, %v1199_v6  ;;  %281 = vst.msk [vmem:[#allocation2 + $0x88] sm:$0xff] %vm263_vm0, %v1199_v6  ;;  %s1008_s26 = sshll.u32 %s1528_s22, 3  ;;  %v299_v51 = vld [vmem:[#allocation2 + $0x18] sm:$0xff]  ;;  %v298_v53 = vld [vmem:[#allocation2 + $0x10] sm:$0xff] }
  0x10   : > { %282 = vst.msk [vmem:[#allocation2 + $0x90] sm:$0xff] %vm263_vm0, %v1199_v6  ;;  %283 = vst.msk [vmem:[#allocation2 + $0x98] sm:$0xff] %vm263_vm0, %v1199_v6  ;;  %s1303_s29 = scalar_lea.vmem %s1518_s0, %s1008_s26  ;;  %v301_v63 = vld [vmem:[#allocation2 + $0x28] sm:$0xff]  ;;  %v300_v1 = vld [vmem:[#allocation2 + $0x20] sm:$0xff]  ;;  %s1391_s7 = scalar_lea.vmem %s1521_s3, %s1008_s26 }
  0x11   : > { %284 = vst.msk [vmem:[#allocation2 + $0xa0] sm:$0xff] %vm263_vm0, %v1199_v6  ;;  %285 = vst.msk [vmem:[#allocation2 + $0xa8] sm:$0xff] %vm263_vm0, %v1199_v6  ;;  %v328_v7 = vld [vmem:[%s1303_s29] sm:$0xff]  ;;  %v329_v9 = vld [vmem:[%s1303_s29 + $0x8] sm:$0xff] }
  0x12   : > { %286 = vst.msk [vmem:[#allocation2 + $0xb0] sm:$0xff] %vm263_vm0, %v1199_v6  ;;  %287 = vst.msk [vmem:[#allocation2 + $0xb8] sm:$0xff] %vm263_vm0, %v1199_v6  ;;  %v344_v8 = vld [vmem:[%s1303_s29 + $0x80] sm:$0xff]  ;;  %v345_v10 = vld [vmem:[%s1303_s29 + $0x88] sm:$0xff]  ;;  %1090 = vmatprep.mubr.msk.f32.mxu0 %vm364_vm1, %v328_v7 }
  0x13   : > { %288 = vst.msk [vmem:[#allocation2 + $0xc0] sm:$0xff] %vm263_vm0, %v1199_v6  ;;  %289 = vst.msk [vmem:[#allocation2 + $0xc8] sm:$0xff] %vm263_vm0, %v1199_v6  ;;  %1114 = vmatprep.mubr.msk.f32.mxu1 %vm364_vm1, %v344_v8  ;;  %v330_v11 = vld [vmem:[%s1303_s29 + $0x10] sm:$0xff]  ;;  %1091 = vmatmul.mubr.msk.f32.vlgmr.msra.gmra.mrb[0].mxu0 %vm364_vm1, %v329_v9  ;;  %v331_v13 = vld [vmem:[%s1303_s29 + $0x18] sm:$0xff] }
  0x14   : > { %290 = vst.msk [vmem:[#allocation2 + $0xd0] sm:$0xff] %vm263_vm0, %v1199_v6  ;;  %291 = vst.msk [vmem:[#allocation2 + $0xd8] sm:$0xff] %vm263_vm0, %v1199_v6  ;;  %v346_v12 = vld [vmem:[%s1303_s29 + $0x90] sm:$0xff]  ;;  %1115 = vmatmul.mubr.msk.f32.vlgmr.msra.gmra.mrb[0].mxu1 %vm364_vm1, %v345_v10  ;;  %1093 = vmatprep.mubr.msk.f32.mxu0 %vm364_vm1, %v330_v11  ;;  %v347_v14 = vld [vmem:[%s1303_s29 + $0x98] sm:$0xff] }
  0x15   : > { %292 = vst.msk [vmem:[#allocation2 + $0xe0] sm:$0xff] %vm263_vm0, %v1199_v6  ;;  %293 = vst.msk [vmem:[#allocation2 + $0xe8] sm:$0xff] %vm263_vm0, %v1199_v6  ;;  %1117 = vmatprep.mubr.msk.f32.mxu1 %vm364_vm1, %v346_v12  ;;  %v332_v15 = vld [vmem:[%s1303_s29 + $0x20] sm:$0xff]  ;;  %v333_v17 = vld [vmem:[%s1303_s29 + $0x28] sm:$0xff] }
  0x16   : > { %294 = vst.msk [vmem:[#allocation2 + $0xf0] sm:$0xff] %vm263_vm0, %v1199_v6  ;;  %295 = vst.msk [vmem:[#allocation2 + $0xf8] sm:$0xff] %vm263_vm0, %v1199_v6  ;;  %v348_v16 = vld [vmem:[%s1303_s29 + $0xa0] sm:$0xff]  ;;  %v349_v18 = vld [vmem:[%s1303_s29 + $0xa8] sm:$0xff] }
  0x17   : > { %1094 = vmatmul.mubr.msk.f32.gmra.mrb[2].mxu0 %vm364_vm1, %v331_v13  ;;  %v334_v19 = vld [vmem:[%s1303_s29 + $0x30] sm:$0xff]  ;;  %v335_v21 = vld [vmem:[%s1303_s29 + $0x38] sm:$0xff]  ;;  %v336_v23 = vld [vmem:[%s1303_s29 + $0x40] sm:$0xff] }
  0x18   : > { %1118 = vmatmul.mubr.msk.f32.gmra.mrb[2].mxu1 %vm364_vm1, %v347_v14  ;;  %1096 = vmatprep.mubr.msk.f32.mxu0 %vm364_vm1, %v332_v15  ;;  %v350_v20 = vld [vmem:[%s1303_s29 + $0xb0] sm:$0xff]  ;;  %v351_v22 = vld [vmem:[%s1303_s29 + $0xb8] sm:$0xff]  ;;  %v352_v24 = vld [vmem:[%s1303_s29 + $0xc0] sm:$0xff] }
  0x19   : > { %1120 = vmatprep.mubr.msk.f32.mxu1 %vm364_vm1, %v348_v16  ;;  %v337_v25 = vld [vmem:[%s1303_s29 + $0x48] sm:$0xff]  ;;  %v338_v27 = vld [vmem:[%s1303_s29 + $0x50] sm:$0xff]  ;;  %v339_v29 = vld [vmem:[%s1303_s29 + $0x58] sm:$0xff] }
  0x1a   : > { %v353_v26 = vld [vmem:[%s1303_s29 + $0xc8] sm:$0xff]  ;;  %v354_v28 = vld [vmem:[%s1303_s29 + $0xd0] sm:$0xff]  ;;  %v355_v30 = vld [vmem:[%s1303_s29 + $0xd8] sm:$0xff] }
  0x1b   : > { %1097 = vmatmul.mubr.msk.f32.gmra.mrb[4].mxu0 %vm364_vm1, %v333_v17  ;;  %v340_v31 = vld [vmem:[%s1303_s29 + $0x60] sm:$0xff]  ;;  %v341_v33 = vld [vmem:[%s1303_s29 + $0x68] sm:$0xff]  ;;  %v342_v35 = vld [vmem:[%s1303_s29 + $0x70] sm:$0xff] }
  0x1c   : > { %1121 = vmatmul.mubr.msk.f32.gmra.mrb[4].mxu1 %vm364_vm1, %v349_v18  ;;  %1099 = vmatprep.mubr.msk.f32.mxu0 %vm364_vm1, %v334_v19  ;;  %v356_v32 = vld [vmem:[%s1303_s29 + $0xe0] sm:$0xff]  ;;  %v357_v34 = vld [vmem:[%s1303_s29 + $0xe8] sm:$0xff]  ;;  %v358_v36 = vld [vmem:[%s1303_s29 + $0xf0] sm:$0xff] }
  0x1d   : > { %1123 = vmatprep.mubr.msk.f32.mxu1 %vm364_vm1, %v350_v20  ;;  %v343_v37 = vld [vmem:[%s1303_s29 + $0x78] sm:$0xff]  ;;  %v313_v40 = vld [vmem:[#allocation2 + $0x88] sm:$0xff]  ;;  %v312_v42 = vld [vmem:[#allocation2 + $0x80] sm:$0xff] }
  0x1e   : > { %v359_v38 = vld [vmem:[%s1303_s29 + $0xf8] sm:$0xff]  ;;  %v314_v54 = vld [vmem:[#allocation2 + $0x90] sm:$0xff]  ;;  %v317_v0 = vld [vmem:[#allocation2 + $0xa8] sm:$0xff] }
  0x1f   : > { %1100 = vmatmul.mubr.msk.f32.gmra.mrb[6].mxu0 %vm364_vm1, %v335_v21  ;;  %v315_v52 = vld [vmem:[#allocation2 + $0x98] sm:$0xff]  ;;  %v316_v2 = vld [vmem:[#allocation2 + $0xa0] sm:$0xff]  ;;  %v302_v16 = vld [vmem:[#allocation2 + $0x30] sm:$0xff] }
  0x20   : > { %1124 = vmatmul.mubr.msk.f32.gmra.mrb[6].mxu1 %vm364_vm1, %v351_v22  ;;  %1102 = vmatprep.mubr.msk.f32.mxu0 %vm364_vm1, %v336_v23  ;;  %v303_v10 = vld [vmem:[#allocation2 + $0x38] sm:$0xff]  ;;  %v318_v21 = vld [vmem:[#allocation2 + $0xb0] sm:$0xff] }
  0x21   : > { %1126 = vmatprep.mubr.msk.f32.mxu1 %vm364_vm1, %v352_v24  ;;  %v319_v11 = vld [vmem:[#allocation2 + $0xb8] sm:$0xff] }
  0x23   : > { %1103 = vmatmul.mubr.msk.f32.gmra.mrb[8].mxu0 %vm364_vm1, %v337_v25 }
  0x24   : > { %1127 = vmatmul.mubr.msk.f32.gmra.mrb[8].mxu1 %vm364_vm1, %v353_v26  ;;  %1105 = vmatprep.mubr.msk.f32.mxu0 %vm364_vm1, %v338_v27 }
  0x25   : > { %1129 = vmatprep.mubr.msk.f32.mxu1 %vm364_vm1, %v354_v28 }
  0x27   : > { %1106 = vmatmul.mubr.msk.f32.gmra.mrb[10].mxu0 %vm364_vm1, %v339_v29 }
  0x28   : > { %1130 = vmatmul.mubr.msk.f32.gmra.mrb[10].mxu1 %vm364_vm1, %v355_v30  ;;  %1108 = vmatprep.mubr.msk.f32.mxu0 %vm364_vm1, %v340_v31 }
  0x29   : > { %1132 = vmatprep.mubr.msk.f32.mxu1 %vm364_vm1, %v356_v32  ;;  %v305_v32 = vld [vmem:[#allocation2 + $0x48] sm:$0xff] }
  0x2b   : > { %1109 = vmatmul.mubr.msk.f32.gmra.mrb[12].mxu0 %vm364_vm1, %v341_v33  ;;  %v321_v33 = vld [vmem:[#allocation2 + $0xc8] sm:$0xff] }
  0x2c   : > { %1133 = vmatmul.mubr.msk.f32.gmra.mrb[12].mxu1 %vm364_vm1, %v357_v34  ;;  %1111 = vmatprep.mubr.msk.f32.mxu0 %vm364_vm1, %v342_v35 }
  0x2d   : > { %1135 = vmatprep.mubr.msk.f32.mxu1 %vm364_vm1, %v358_v36 }
  0x2f   : > { %1112 = vmatmul.mubr.msk.f32.gmra.mrb[14].mxu0 %vm364_vm1, %v343_v37 }
  0x30   : > { %1136 = vmatmul.mubr.msk.f32.gmra.mrb[14].mxu1 %vm364_vm1, %v359_v38 }
  0xe6   : > { %v1092_v43 = vpop.f32.mrb[0].mxu0 }
  0xe7   : > { %v1116_v44 = vpop.f32.mrb[0].mxu1  ;;  %v687_v45 = vadd.f32 %v1092_v43, %v297_v39  ;;  %v527_v47 = vpop.f32.mrb[1].mxu0 }
  0xe8   : > { %v703_v46 = vadd.f32 %v1116_v44, %v313_v40  ;;  %v607_v48 = vpop.f32.mrb[1].mxu1  ;;  %v686_v49 = vadd.f32 %v527_v47, %v296_v41  ;;  %v304_v40 = vld [vmem:[#allocation2 + $0x40] sm:$0xff] }
  0xe9   : > { %v702_v50 = vadd.f32 %v607_v48, %v312_v42  ;;  %720 = vst.msk [vmem:[#allocation2 + $0x8] sm:$0xff] %vm263_vm0, %v687_v45  ;;  %v320_v45 = vld [vmem:[#allocation2 + $0xc0] sm:$0xff] }
  0xea   : > { %736 = vst.msk [vmem:[#allocation2 + $0x88] sm:$0xff] %vm263_vm0, %v703_v46  ;;  %719 = vst.msk [vmem:[#allocation2] sm:$0xff] %vm263_vm0, %v686_v49  ;;  %v1095_v55 = vpop.f32.mrb[2].mxu0 }
  0xeb   : > { %735 = vst.msk [vmem:[#allocation2 + $0x80] sm:$0xff] %vm263_vm0, %v702_v50  ;;  %v1119_v56 = vpop.f32.mrb[2].mxu1  ;;  %v689_v57 = vadd.f32 %v1095_v55, %v299_v51  ;;  %v537_v59 = vpop.f32.mrb[3].mxu0 }
  0xec   : > { %v705_v58 = vadd.f32 %v1119_v56, %v315_v52  ;;  %v617_v60 = vpop.f32.mrb[3].mxu1  ;;  %v688_v61 = vadd.f32 %v537_v59, %v298_v53  ;;  %v307_v56 = vld [vmem:[#allocation2 + $0x58] sm:$0xff] }
  0xed   : > { %v704_v62 = vadd.f32 %v617_v60, %v314_v54  ;;  %722 = vst.msk [vmem:[#allocation2 + $0x18] sm:$0xff] %vm263_vm0, %v689_v57  ;;  %v323_v57 = vld [vmem:[#allocation2 + $0xd8] sm:$0xff] }
  0xee   : > { %738 = vst.msk [vmem:[#allocation2 + $0x98] sm:$0xff] %vm263_vm0, %v705_v58  ;;  %721 = vst.msk [vmem:[#allocation2 + $0x10] sm:$0xff] %vm263_vm0, %v688_v61  ;;  %v1098_v4 = vpop.f32.mrb[4].mxu0 }
  0xef   : > { %737 = vst.msk [vmem:[#allocation2 + $0x90] sm:$0xff] %vm263_vm0, %v704_v62  ;;  %v1122_v5 = vpop.f32.mrb[4].mxu1  ;;  %v691_v6 = vadd.f32 %v1098_v4, %v301_v63  ;;  %v547_v8 = vpop.f32.mrb[5].mxu0 }
  0xf0   : > { %v707_v7 = vadd.f32 %v1122_v5, %v317_v0  ;;  %v627_v9 = vpop.f32.mrb[5].mxu1  ;;  %v755_v12 = vld [vmem:[#allocation2 + $0x8] sm:$0xff]  ;;  %v690_v14 = vadd.f32 %v547_v8, %v300_v1  ;;  %v306_v0 = vld [vmem:[#allocation2 + $0x50] sm:$0xff] }
  0xf1   : > { %v771_v13 = vld [vmem:[#allocation2 + $0x88] sm:$0xff]  ;;  %v706_v15 = vadd.f32 %v627_v9, %v316_v2  ;;  %v794_v17 = vadd.f32 %v1378_v3, %v755_v12  ;;  %v754_v19 = vld [vmem:[#allocation2] sm:$0xff]  ;;  %724 = vst.msk [vmem:[#allocation2 + $0x28] sm:$0xff] %vm263_vm0, %v691_v6  ;;  %v322_v6 = vld [vmem:[#allocation2 + $0xd0] sm:$0xff] }
  0xf2   : > { %v810_v18 = vadd.f32 %v1378_v3, %v771_v13  ;;  %v770_v20 = vld [vmem:[#allocation2 + $0x80] sm:$0xff]  ;;  %740 = vst.msk [vmem:[#allocation2 + $0xa8] sm:$0xff] %vm263_vm0, %v707_v7  ;;  %v793_v22 = vadd.f32 %v1378_v3, %v754_v19  ;;  %723 = vst.msk [vmem:[#allocation2 + $0x20] sm:$0xff] %vm263_vm0, %v690_v14  ;;  %v1101_v24 = vpop.f32.mrb[6].mxu0 }
  0xf3   : > { %v809_v23 = vadd.f32 %v1378_v3, %v770_v20  ;;  %739 = vst.msk [vmem:[#allocation2 + $0xa0] sm:$0xff] %vm263_vm0, %v706_v15  ;;  %v1125_v25 = vpop.f32.mrb[6].mxu1  ;;  %v826_v26 = vmax.f32 %v794_v17, 0.0  ;;  %v693_v28 = vadd.f32 %v1101_v24, %v303_v10  ;;  %v557_v30 = vpop.f32.mrb[7].mxu0  ;;  %v309_v17 = vld [vmem:[#allocation2 + $0x68] sm:$0xff] }
  0xf4   : > { %v842_v27 = vmax.f32 %v810_v18, 0.0  ;;  %v709_v29 = vadd.f32 %v1125_v25, %v319_v11  ;;  %v637_v31 = vpop.f32.mrb[7].mxu1  ;;  %v825_v34 = vmax.f32 %v793_v22, 0.0  ;;  %v757_v36 = vld [vmem:[#allocation2 + $0x18] sm:$0xff]  ;;  %v692_v38 = vadd.f32 %v557_v30, %v302_v16  ;;  %v325_v18 = vld [vmem:[#allocation2 + $0xe8] sm:$0xff]  ;;  %v308_v25 = vld [vmem:[#allocation2 + $0x60] sm:$0xff] }
  0xf5   : > { %v841_v35 = vmax.f32 %v809_v23, 0.0  ;;  %v773_v37 = vld [vmem:[#allocation2 + $0x98] sm:$0xff]  ;;  %v708_v39 = vadd.f32 %v637_v31, %v318_v21  ;;  %858 = vst.msk [vmem:[%s1391_s7 + $0x8] sm:$0xff] %vm263_vm0, %v826_v26  ;;  %v796_v41 = vadd.f32 %v1378_v3, %v757_v36  ;;  %v756_v43 = vld [vmem:[#allocation2 + $0x10] sm:$0xff]  ;;  %726 = vst.msk [vmem:[#allocation2 + $0x38] sm:$0xff] %vm263_vm0, %v693_v28 }
  0xf6   : > { %874 = vst.msk [vmem:[%s1391_s7 + $0x88] sm:$0xff] %vm263_vm0, %v842_v27  ;;  %v812_v42 = vadd.f32 %v1378_v3, %v773_v37  ;;  %v772_v44 = vld [vmem:[#allocation2 + $0x90] sm:$0xff]  ;;  %742 = vst.msk [vmem:[#allocation2 + $0xb8] sm:$0xff] %vm263_vm0, %v709_v29  ;;  %v795_v46 = vadd.f32 %v1378_v3, %v756_v43  ;;  %v1104_v48 = vpop.f32.mrb[8].mxu0  ;;  %v324_v30 = vld [vmem:[#allocation2 + $0xe0] sm:$0xff] }
  0xf7   : > { %857 = vst.msk [vmem:[%s1391_s7] sm:$0xff] %vm263_vm0, %v825_v34  ;;  %873 = vst.msk [vmem:[%s1391_s7 + $0x80] sm:$0xff] %vm263_vm0, %v841_v35  ;;  %v811_v47 = vadd.f32 %v1378_v3, %v772_v44  ;;  %v1128_v49 = vpop.f32.mrb[8].mxu1  ;;  %v828_v50 = vmax.f32 %v796_v41, 0.0  ;;  %v695_v52 = vadd.f32 %v1104_v48, %v305_v32  ;;  %v567_v54 = vpop.f32.mrb[9].mxu0  ;;  %v311_v41 = vld [vmem:[#allocation2 + $0x78] sm:$0xff] }
  0xf8   : > { %725 = vst.msk [vmem:[#allocation2 + $0x30] sm:$0xff] %vm263_vm0, %v692_v38  ;;  %741 = vst.msk [vmem:[#allocation2 + $0xb0] sm:$0xff] %vm263_vm0, %v708_v39  ;;  %v844_v51 = vmax.f32 %v812_v42, 0.0  ;;  %v711_v53 = vadd.f32 %v1128_v49, %v321_v33  ;;  %v647_v55 = vpop.f32.mrb[9].mxu1  ;;  %v827_v58 = vmax.f32 %v795_v46, 0.0  ;;  %v759_v60 = vld [vmem:[#allocation2 + $0x28] sm:$0xff]  ;;  %v694_v62 = vadd.f32 %v567_v54, %v304_v40 }
  0xf9   : > { %v843_v59 = vmax.f32 %v811_v47, 0.0  ;;  %v775_v61 = vld [vmem:[#allocation2 + $0xa8] sm:$0xff]  ;;  %v710_v63 = vadd.f32 %v647_v55, %v320_v45  ;;  %860 = vst.msk [vmem:[%s1391_s7 + $0x18] sm:$0xff] %vm263_vm0, %v828_v50  ;;  %v798_v1 = vadd.f32 %v1378_v3, %v759_v60  ;;  %v758_v4 = vld [vmem:[#allocation2 + $0x20] sm:$0xff]  ;;  %728 = vst.msk [vmem:[#allocation2 + $0x48] sm:$0xff] %vm263_vm0, %v695_v52 }
  0xfa   : > { %876 = vst.msk [vmem:[%s1391_s7 + $0x98] sm:$0xff] %vm263_vm0, %v844_v51  ;;  %v814_v2 = vadd.f32 %v1378_v3, %v775_v61  ;;  %v774_v5 = vld [vmem:[#allocation2 + $0xa0] sm:$0xff]  ;;  %744 = vst.msk [vmem:[#allocation2 + $0xc8] sm:$0xff] %vm263_vm0, %v711_v53  ;;  %v797_v7 = vadd.f32 %v1378_v3, %v758_v4  ;;  %v1107_v9 = vpop.f32.mrb[10].mxu0  ;;  %v327_v42 = vld [vmem:[#allocation2 + $0xf8] sm:$0xff] }
  0xfb   : > { %859 = vst.msk [vmem:[%s1391_s7 + $0x10] sm:$0xff] %vm263_vm0, %v827_v58  ;;  %875 = vst.msk [vmem:[%s1391_s7 + $0x90] sm:$0xff] %vm263_vm0, %v843_v59  ;;  %v813_v8 = vadd.f32 %v1378_v3, %v774_v5  ;;  %v1131_v10 = vpop.f32.mrb[10].mxu1  ;;  %v830_v11 = vmax.f32 %v798_v1, 0.0  ;;  %v697_v13 = vadd.f32 %v1107_v9, %v307_v56  ;;  %v577_v15 = vpop.f32.mrb[11].mxu0  ;;  %v310_v49 = vld [vmem:[#allocation2 + $0x70] sm:$0xff] }
  0xfc   : > { %727 = vst.msk [vmem:[#allocation2 + $0x40] sm:$0xff] %vm263_vm0, %v694_v62  ;;  %743 = vst.msk [vmem:[#allocation2 + $0xc0] sm:$0xff] %vm263_vm0, %v710_v63  ;;  %v846_v12 = vmax.f32 %v814_v2, 0.0  ;;  %v713_v14 = vadd.f32 %v1131_v10, %v323_v57  ;;  %v657_v16 = vpop.f32.mrb[11].mxu1  ;;  %v829_v19 = vmax.f32 %v797_v7, 0.0  ;;  %v761_v21 = vld [vmem:[#allocation2 + $0x38] sm:$0xff]  ;;  %v696_v23 = vadd.f32 %v577_v15, %v306_v0 }
  0xfd   : > { %v845_v20 = vmax.f32 %v813_v8, 0.0  ;;  %v777_v22 = vld [vmem:[#allocation2 + $0xb8] sm:$0xff]  ;;  %v712_v24 = vadd.f32 %v657_v16, %v322_v6  ;;  %862 = vst.msk [vmem:[%s1391_s7 + $0x28] sm:$0xff] %vm263_vm0, %v830_v11  ;;  %v800_v26 = vadd.f32 %v1378_v3, %v761_v21  ;;  %730 = vst.msk [vmem:[#allocation2 + $0x58] sm:$0xff] %vm263_vm0, %v697_v13  ;;  %v326_v54 = vld [vmem:[#allocation2 + $0xf0] sm:$0xff] }
  0xfe   : > { %878 = vst.msk [vmem:[%s1391_s7 + $0xa8] sm:$0xff] %vm263_vm0, %v846_v12  ;;  %v816_v27 = vadd.f32 %v1378_v3, %v777_v22  ;;  %746 = vst.msk [vmem:[#allocation2 + $0xd8] sm:$0xff] %vm263_vm0, %v713_v14  ;;  %v1110_v33 = vpop.f32.mrb[12].mxu0 }
  0xff   : > { %v760_v28 = vld [vmem:[#allocation2 + $0x30] sm:$0xff]  ;;  %861 = vst.msk [vmem:[%s1391_s7 + $0x20] sm:$0xff] %vm263_vm0, %v829_v19  ;;  %877 = vst.msk [vmem:[%s1391_s7 + $0xa0] sm:$0xff] %vm263_vm0, %v845_v20  ;;  %v1134_v34 = vpop.f32.mrb[12].mxu1  ;;  %v832_v35 = vmax.f32 %v800_v26, 0.0  ;;  %v699_v37 = vadd.f32 %v1110_v33, %v309_v17  ;;  %v587_v39 = vpop.f32.mrb[13].mxu0 }
 0x100   : > { %v776_v29 = vld [vmem:[#allocation2 + $0xb0] sm:$0xff]  ;;  %v799_v31 = vadd.f32 %v1378_v3, %v760_v28  ;;  %729 = vst.msk [vmem:[#allocation2 + $0x50] sm:$0xff] %vm263_vm0, %v696_v23  ;;  %745 = vst.msk [vmem:[#allocation2 + $0xd0] sm:$0xff] %vm263_vm0, %v712_v24  ;;  %v848_v36 = vmax.f32 %v816_v27, 0.0  ;;  %v715_v38 = vadd.f32 %v1134_v34, %v325_v18  ;;  %v667_v40 = vpop.f32.mrb[13].mxu1  ;;  %v763_v45 = vld [vmem:[#allocation2 + $0x48] sm:$0xff]  ;;  %v698_v47 = vadd.f32 %v587_v39, %v308_v25 }
 0x101   : > { %v815_v32 = vadd.f32 %v1378_v3, %v776_v29  ;;  %v779_v46 = vld [vmem:[#allocation2 + $0xc8] sm:$0xff]  ;;  %v714_v48 = vadd.f32 %v667_v40, %v324_v30  ;;  %864 = vst.msk [vmem:[%s1391_s7 + $0x38] sm:$0xff] %vm263_vm0, %v832_v35  ;;  %v802_v50 = vadd.f32 %v1378_v3, %v763_v45  ;;  %732 = vst.msk [vmem:[#allocation2 + $0x68] sm:$0xff] %vm263_vm0, %v699_v37 }
 0x102   : > { %v831_v43 = vmax.f32 %v799_v31, 0.0  ;;  %880 = vst.msk [vmem:[%s1391_s7 + $0xb8] sm:$0xff] %vm263_vm0, %v848_v36  ;;  %v818_v51 = vadd.f32 %v1378_v3, %v779_v46  ;;  %748 = vst.msk [vmem:[#allocation2 + $0xe8] sm:$0xff] %vm263_vm0, %v715_v38  ;;  %v1113_v57 = vpop.f32.mrb[14].mxu0 }
 0x103   : > { %v847_v44 = vmax.f32 %v815_v32, 0.0  ;;  %v762_v52 = vld [vmem:[#allocation2 + $0x40] sm:$0xff]  ;;  %731 = vst.msk [vmem:[#allocation2 + $0x60] sm:$0xff] %vm263_vm0, %v698_v47  ;;  %747 = vst.msk [vmem:[#allocation2 + $0xe0] sm:$0xff] %vm263_vm0, %v714_v48  ;;  %v1137_v58 = vpop.f32.mrb[14].mxu1  ;;  %v834_v59 = vmax.f32 %v802_v50, 0.0  ;;  %v701_v61 = vadd.f32 %v1113_v57, %v311_v41 }
 0x104   : > { %v778_v53 = vld [vmem:[#allocation2 + $0xc0] sm:$0xff]  ;;  %863 = vst.msk [vmem:[%s1391_s7 + $0x30] sm:$0xff] %vm263_vm0, %v831_v43  ;;  %v801_v55 = vadd.f32 %v1378_v3, %v762_v52  ;;  %v850_v60 = vmax.f32 %v818_v51, 0.0  ;;  %v717_v62 = vadd.f32 %v1137_v58, %v327_v42  ;;  %v597_v63 = vpop.f32.mrb[15].mxu0  ;;  %v677_v0 = vpop.f32.mrb[15].mxu1  ;;  %v765_v4 = vld [vmem:[#allocation2 + $0x58] sm:$0xff] }
 0x105   : > { %879 = vst.msk [vmem:[%s1391_s7 + $0xb0] sm:$0xff] %vm263_vm0, %v847_v44  ;;  %v817_v56 = vadd.f32 %v1378_v3, %v778_v53  ;;  %v781_v5 = vld [vmem:[#allocation2 + $0xd8] sm:$0xff]  ;;  %v700_v6 = vadd.f32 %v597_v63, %v310_v49  ;;  %v716_v7 = vadd.f32 %v677_v0, %v326_v54  ;;  %866 = vst.msk [vmem:[%s1391_s7 + $0x48] sm:$0xff] %vm263_vm0, %v834_v59 }
 0x106   : > { %v833_v1 = vmax.f32 %v801_v55, 0.0  ;;  %882 = vst.msk [vmem:[%s1391_s7 + $0xc8] sm:$0xff] %vm263_vm0, %v850_v60  ;;  %v804_v8 = vadd.f32 %v1378_v3, %v765_v4  ;;  %v820_v9 = vadd.f32 %v1378_v3, %v781_v5  ;;  %734 = vst.msk [vmem:[#allocation2 + $0x78] sm:$0xff] %vm263_vm0, %v701_v61 }
 0x107   : > { %v849_v2 = vmax.f32 %v817_v56, 0.0  ;;  %v764_v10 = vld [vmem:[#allocation2 + $0x50] sm:$0xff]  ;;  %750 = vst.msk [vmem:[#allocation2 + $0xf8] sm:$0xff] %vm263_vm0, %v717_v62  ;;  %733 = vst.msk [vmem:[#allocation2 + $0x70] sm:$0xff] %vm263_vm0, %v700_v6 }
 0x108   : > { %v780_v11 = vld [vmem:[#allocation2 + $0xd0] sm:$0xff]  ;;  %865 = vst.msk [vmem:[%s1391_s7 + $0x40] sm:$0xff] %vm263_vm0, %v833_v1  ;;  %v803_v12 = vadd.f32 %v1378_v3, %v764_v10  ;;  %749 = vst.msk [vmem:[#allocation2 + $0xf0] sm:$0xff] %vm263_vm0, %v716_v7  ;;  %v836_v14 = vmax.f32 %v804_v8, 0.0  ;;  %v852_v15 = vmax.f32 %v820_v9, 0.0  ;;  %v767_v18 = vld [vmem:[#allocation2 + $0x68] sm:$0xff] }
 0x109   : > { %881 = vst.msk [vmem:[%s1391_s7 + $0xc0] sm:$0xff] %vm263_vm0, %v849_v2  ;;  %v819_v13 = vadd.f32 %v1378_v3, %v780_v11  ;;  %v783_v19 = vld [vmem:[#allocation2 + $0xe8] sm:$0xff]  ;;  %v806_v20 = vadd.f32 %v1378_v3, %v767_v18 }
 0x10a   : > { %v835_v16 = vmax.f32 %v803_v12, 0.0  ;;  %868 = vst.msk [vmem:[%s1391_s7 + $0x58] sm:$0xff] %vm263_vm0, %v836_v14  ;;  %884 = vst.msk [vmem:[%s1391_s7 + $0xd8] sm:$0xff] %vm263_vm0, %v852_v15  ;;  %v822_v21 = vadd.f32 %v1378_v3, %v783_v19  ;;  %v766_v22 = vld [vmem:[#allocation2 + $0x60] sm:$0xff] }
 0x10b   : > { %v851_v17 = vmax.f32 %v819_v13, 0.0  ;;  %v782_v23 = vld [vmem:[#allocation2 + $0xe0] sm:$0xff]  ;;  %v805_v24 = vadd.f32 %v1378_v3, %v766_v22  ;;  %v838_v26 = vmax.f32 %v806_v20, 0.0 }
 0x10c   : > { %867 = vst.msk [vmem:[%s1391_s7 + $0x50] sm:$0xff] %vm263_vm0, %v835_v16  ;;  %v821_v25 = vadd.f32 %v1378_v3, %v782_v23  ;;  %v854_v27 = vmax.f32 %v822_v21, 0.0 }
 0x10d   : > { %883 = vst.msk [vmem:[%s1391_s7 + $0xd0] sm:$0xff] %vm263_vm0, %v851_v17  ;;  %v837_v28 = vmax.f32 %v805_v24, 0.0  ;;  %v769_v30 = vld [vmem:[#allocation2 + $0x78] sm:$0xff]  ;;  %870 = vst.msk [vmem:[%s1391_s7 + $0x68] sm:$0xff] %vm263_vm0, %v838_v26 }
 0x10e   : > { %v853_v29 = vmax.f32 %v821_v25, 0.0  ;;  %v785_v31 = vld [vmem:[#allocation2 + $0xf8] sm:$0xff]  ;;  %886 = vst.msk [vmem:[%s1391_s7 + $0xe8] sm:$0xff] %vm263_vm0, %v854_v27  ;;  %v808_v32 = vadd.f32 %v1378_v3, %v769_v30  ;;  %v768_v34 = vld [vmem:[#allocation2 + $0x70] sm:$0xff] }
 0x10f   : > { %v824_v33 = vadd.f32 %v1378_v3, %v785_v31  ;;  %v784_v35 = vld [vmem:[#allocation2 + $0xf0] sm:$0xff]  ;;  %869 = vst.msk [vmem:[%s1391_s7 + $0x60] sm:$0xff] %vm263_vm0, %v837_v28  ;;  %v807_v36 = vadd.f32 %v1378_v3, %v768_v34 }
 0x110   : > { %885 = vst.msk [vmem:[%s1391_s7 + $0xe0] sm:$0xff] %vm263_vm0, %v853_v29  ;;  %v823_v37 = vadd.f32 %v1378_v3, %v784_v35  ;;  %v840_v38 = vmax.f32 %v808_v32, 0.0 }
 0x111   : > { %v856_v39 = vmax.f32 %v824_v33, 0.0  ;;  %v839_v40 = vmax.f32 %v807_v36, 0.0 }
 0x112   : > { %v855_v41 = vmax.f32 %v823_v37, 0.0  ;;  %872 = vst.msk [vmem:[%s1391_s7 + $0x78] sm:$0xff] %vm263_vm0, %v840_v38 }
 0x113   : > { %888 = vst.msk [vmem:[%s1391_s7 + $0xf8] sm:$0xff] %vm263_vm0, %v856_v39  ;;  %871 = vst.msk [vmem:[%s1391_s7 + $0x70] sm:$0xff] %vm263_vm0, %v839_v40 }
 0x114   : > { %887 = vst.msk [vmem:[%s1391_s7 + $0xf0] sm:$0xff] %vm263_vm0, %v855_v41 }
 0x115 PF: > { %s13_s14 = sadd.s32 1, %s1197_s14   ;;  %s1523_s12 = smov %s1193_s13 }
 0x116   : > { %p10_p5 = scmp.ge.s32.totalorder %s13_s14, 4   ;;  %s1524_s13 = smov %s1526_s15 }
 0x118   :  { %12 = sbr.rel (!%p10_p5) target bundleno = 2 (0x2), region = 76 }

</bundles_post_ra>
